<compile_context>
chip_gen: v7x
topology: tpu7x:2x2x1
jax: 0.10.0
libtpu: 0.0.40
codegen_flags: <defaults>
</compile_context>

<pallas_src>
import jax
import jax.numpy as jnp
from jax.experimental import pallas as pl
from jax.experimental.pallas import tpu as pltpu

LANE = 128  # TPU lane width


def _lstm_fc_kernel(xw_ref, whh_ref, wfc_ref, bfc_ref, out_ref):
    """xw_ref: (T, B, 4*Hp) precomputed x@W_ih + bias (time-major).
       whh_ref: (Hp, 4*Hp), wfc_ref: (Hp, 1), bfc_ref: (1, 1), out_ref: (B, 1)."""
    T, B, _ = xw_ref.shape
    Hp = whh_ref.shape[0]

    h0 = jnp.zeros((B, Hp), jnp.float32)
    c0 = jnp.zeros((B, Hp), jnp.float32)

    def step(t, carry):
        h, c = carry
        # gates: (B, 4*Hp) = precomputed input projection + h_{t-1} @ W_hh^T
        gates = xw_ref[t] + jnp.dot(h, whh_ref[...],
                                    preferred_element_type=jnp.float32)
        # Lane-aligned gate slices (Hp = 128).
        i = jax.nn.sigmoid(gates[:, 0 * Hp:1 * Hp])
        f = jax.nn.sigmoid(gates[:, 1 * Hp:2 * Hp])
        g = jnp.tanh(gates[:, 2 * Hp:3 * Hp])
        o = jax.nn.sigmoid(gates[:, 3 * Hp:4 * Hp])
        c_new = f * c + i * g
        h_new = o * jnp.tanh(c_new)
        return (h_new, c_new)

    h_last, _ = jax.lax.fori_loop(0, T, step, (h0, c0), unroll=True)

    # fc(out[:, -1, :]) — padded rows of wfc are zero, so this is exact.
    y = (jnp.dot(h_last, wfc_ref[...], preferred_element_type=jnp.float32)
         + bfc_ref[...])
    out_ref[...] = y.astype(out_ref.dtype)


@jax.jit
def weather_forecaster(x, params):
    """x: (B, T, D) float32 (batch_first, like the PyTorch module). Returns (B, 1)."""
    wih_p, whh_p, b_p, wfc_p, bfc = params
    B, T, D = x.shape

    # Hoisted input projection for all timesteps in one matmul; 'tbg' output
    # layout folds the batch_first -> time-major transpose into the same op.
    xw = (jnp.einsum("btd,dg->tbg", x, wih_p,
                     precision=jax.lax.Precision.HIGHEST)
          + b_p)  # (T, B, 4*Hp)

    return pl.pallas_call(
        _lstm_fc_kernel,
        out_shape=jax.ShapeDtypeStruct((B, 1), jnp.float32),
        in_specs=[
            pl.BlockSpec(memory_space=pltpu.MemorySpace.VMEM),  # xw (T,B,4Hp)
            pl.BlockSpec(memory_space=pltpu.MemorySpace.VMEM),  # W_hh (Hp,4Hp)
            pl.BlockSpec(memory_space=pltpu.MemorySpace.VMEM),  # W_fc (Hp,1)
            pl.BlockSpec(memory_space=pltpu.MemorySpace.VMEM),  # b_fc (1,1)
        ],
        out_specs=pl.BlockSpec(memory_space=pltpu.MemorySpace.VMEM),
    )(xw, whh_p, wfc_p, bfc)


def init_params(key, input_size=5, hidden_size=64):
    """PyTorch-style init (uniform +-1/sqrt(H)); returns (kernel params, raw params).

    Kernel params use lane-padded gate blocks: each of the 4 gates occupies Hp=128
    lanes, with the last Hp-H weight/bias columns zero.  W_hh / W_fc rows beyond H
    are also zero so the padded hidden lanes never contribute."""
    H, D = hidden_size, input_size
    Hp = ((H + LANE - 1) // LANE) * LANE
    k = 1.0 / jnp.sqrt(jnp.float32(H))
    keys = jax.random.split(key, 6)
    w_ih = jax.random.uniform(keys[0], (4 * H, D), jnp.float32, -k, k)   # weight_ih_l0
    w_hh = jax.random.uniform(keys[1], (4 * H, H), jnp.float32, -k, k)   # weight_hh_l0
    b_ih = jax.random.uniform(keys[2], (4 * H,), jnp.float32, -k, k)
    b_hh = jax.random.uniform(keys[3], (4 * H,), jnp.float32, -k, k)
    w_fc = jax.random.uniform(keys[4], (1, H), jnp.float32, -k, k)       # nn.Linear(H, 1)
    b_fc = jax.random.uniform(keys[5], (1,), jnp.float32, -k, k)

    def pad_gate_cols(w_t):  # (rows, 4H) -> (rows, 4Hp), zero-pad each gate block
        rows = w_t.shape[0]
        w4 = w_t.reshape(rows, 4, H)
        return jnp.pad(w4, ((0, 0), (0, 0), (0, Hp - H))).reshape(rows, 4 * Hp)

    wih_p = pad_gate_cols(w_ih.T)                                        # (D, 4Hp)
    whh_p = jnp.pad(pad_gate_cols(w_hh.T), ((0, Hp - H), (0, 0)))        # (Hp, 4Hp)
    b_p = pad_gate_cols((b_ih + b_hh)[None, :])                          # (1, 4Hp)
    wfc_p = jnp.pad(w_fc.T, ((0, Hp - H), (0, 0)))                       # (Hp, 1)
    bfc = b_fc[None, :]                                                  # (1, 1)

    kernel_params = (wih_p, whh_p, b_p, wfc_p, bfc)
    raw_params = (w_ih, w_hh, b_ih, b_hh, w_fc, b_fc)
    return kernel_params, raw_params


def _reference(x, raw_params):
    """Pure-JAX reference of the PyTorch forward pass (unpadded weights)."""
    w_ih, w_hh, b_ih, b_hh, w_fc, b_fc = raw_params
    B, T, D = x.shape
    H = w_hh.shape[1]
    hp = jax.lax.Precision.HIGHEST
    h = jnp.zeros((B, H), jnp.float32)
    c = jnp.zeros((B, H), jnp.float32)

    def step(carry, x_t):
        h, c = carry
        gates = (jnp.dot(x_t, w_ih.T, precision=hp) + b_ih
                 + jnp.dot(h, w_hh.T, precision=hp) + b_hh)
        i = jax.nn.sigmoid(gates[:, 0 * H:1 * H])
        f = jax.nn.sigmoid(gates[:, 1 * H:2 * H])
        g = jnp.tanh(gates[:, 2 * H:3 * H])
        o = jax.nn.sigmoid(gates[:, 3 * H:4 * H])
        c = f * c + i * g
        h = o * jnp.tanh(c)
        return (h, c), None

    (h, _), _ = jax.lax.scan(step, (h, c), jnp.transpose(x, (1, 0, 2)))
    return jnp.dot(h, w_fc.T, precision=hp) + b_fc


if __name__ == "__main__":
    key = jax.random.PRNGKey(0)
    k_param, k_x = jax.random.split(key)

    B, T, D, H = 2, 8, 5, 64
    params, raw = init_params(k_param, input_size=D, hidden_size=H)
    x = jax.random.normal(k_x, (B, T, D), jnp.float32)

    out = jax.block_until_ready(weather_forecaster(x, params))

    ref = _reference(x, raw)
    assert out.shape == (B, 1)
    assert jnp.allclose(out, ref, atol=1e-4, rtol=1e-4), (out, ref)

    print("KERNEL_OK")
</pallas_src>

<mosaic_0001>
module attributes {stable_mosaic.version = 11 : i64} {
  func.func @_lstm_fc_kernel(%arg0: memref<8x2x512xf32, #tpu.memory_space<vmem>>, %arg1: memref<128x512xf32, #tpu.memory_space<vmem>>, %arg2: memref<128x1xf32, #tpu.memory_space<vmem>>, %arg3: memref<1x1xf32, #tpu.memory_space<vmem>>, %arg4: memref<2x1xf32, #tpu.memory_space<vmem>>) attributes {dimension_semantics = [], scalar_prefetch = 0 : i64, scratch_operands = 0 : i64, tpu.core_type = #tpu.core_type<tc>} {
    %cst = arith.constant 0.000000e+00 : f32
    %0 = vector.broadcast %cst : f32 to vector<2x128xf32>
    %cst_0 = arith.constant 0.000000e+00 : f32
    %1 = vector.broadcast %cst_0 : f32 to vector<2x128xf32>
    %c0_i32 = arith.constant 0 : i32
    %2 = arith.index_cast %c0_i32 : i32 to index
    %c0 = arith.constant 0 : index
    %c0_1 = arith.constant 0 : index
    %3 = vector.load %arg0[%2, %c0, %c0_1] : memref<8x2x512xf32, #tpu.memory_space<vmem>>, vector<1x2x512xf32>
    %4 = vector.shape_cast %3 : vector<1x2x512xf32> to vector<2x512xf32>
    %c0_2 = arith.constant 0 : index
    %c0_3 = arith.constant 0 : index
    %5 = vector.load %arg1[%c0_2, %c0_3] : memref<128x512xf32, #tpu.memory_space<vmem>>, vector<128x512xf32>
    %cst_4 = arith.constant dense<0.000000e+00> : vector<2x512xf32>
    %6 = tpu.matmul %0, %5, %cst_4 {dimension_numbers = #tpu.dot_dimension_numbers<[1], [0], [0], [1], [0, 0, 1, 1], [], []>} : vector<2x128xf32>, vector<128x512xf32>, vector<2x512xf32> -> vector<2x512xf32>
    %7 = arith.addf %4, %6 : vector<2x512xf32>
    %8 = vector.extract_strided_slice %7 {offsets = [0, 0], sizes = [2, 128], strides = [1, 1]} : vector<2x512xf32> to vector<2x128xf32>
    %9 = arith.negf %8 : vector<2x128xf32>
    %10 = math.exp %9 : vector<2x128xf32>
    %cst_5 = arith.constant 1.000000e+00 : f32
    %11 = vector.broadcast %cst_5 : f32 to vector<2x128xf32>
    %12 = arith.addf %11, %10 : vector<2x128xf32>
    %13 = arith.divf %11, %12 : vector<2x128xf32>
    %14 = vector.extract_strided_slice %7 {offsets = [0, 128], sizes = [2, 128], strides = [1, 1]} : vector<2x512xf32> to vector<2x128xf32>
    %15 = arith.negf %14 : vector<2x128xf32>
    %16 = math.exp %15 : vector<2x128xf32>
    %cst_6 = arith.constant 1.000000e+00 : f32
    %17 = vector.broadcast %cst_6 : f32 to vector<2x128xf32>
    %18 = arith.addf %17, %16 : vector<2x128xf32>
    %19 = arith.divf %17, %18 : vector<2x128xf32>
    %20 = vector.extract_strided_slice %7 {offsets = [0, 256], sizes = [2, 128], strides = [1, 1]} : vector<2x512xf32> to vector<2x128xf32>
    %21 = math.tanh %20 : vector<2x128xf32>
    %22 = vector.extract_strided_slice %7 {offsets = [0, 384], sizes = [2, 128], strides = [1, 1]} : vector<2x512xf32> to vector<2x128xf32>
    %23 = arith.negf %22 : vector<2x128xf32>
    %24 = math.exp %23 : vector<2x128xf32>
    %cst_7 = arith.constant 1.000000e+00 : f32
    %25 = vector.broadcast %cst_7 : f32 to vector<2x128xf32>
    %26 = arith.addf %25, %24 : vector<2x128xf32>
    %27 = arith.divf %25, %26 : vector<2x128xf32>
    %28 = arith.mulf %19, %1 : vector<2x128xf32>
    %29 = arith.mulf %13, %21 : vector<2x128xf32>
    %30 = arith.addf %28, %29 : vector<2x128xf32>
    %31 = math.tanh %30 : vector<2x128xf32>
    %32 = arith.mulf %27, %31 : vector<2x128xf32>
    %c1_i32 = arith.constant 1 : i32
    %33 = arith.index_cast %c1_i32 : i32 to index
    %c0_8 = arith.constant 0 : index
    %c0_9 = arith.constant 0 : index
    %34 = vector.load %arg0[%33, %c0_8, %c0_9] : memref<8x2x512xf32, #tpu.memory_space<vmem>>, vector<1x2x512xf32>
    %35 = vector.shape_cast %34 : vector<1x2x512xf32> to vector<2x512xf32>
    %c0_10 = arith.constant 0 : index
    %c0_11 = arith.constant 0 : index
    %36 = vector.load %arg1[%c0_10, %c0_11] : memref<128x512xf32, #tpu.memory_space<vmem>>, vector<128x512xf32>
    %cst_12 = arith.constant dense<0.000000e+00> : vector<2x512xf32>
    %37 = tpu.matmul %32, %36, %cst_12 {dimension_numbers = #tpu.dot_dimension_numbers<[1], [0], [0], [1], [0, 0, 1, 1], [], []>} : vector<2x128xf32>, vector<128x512xf32>, vector<2x512xf32> -> vector<2x512xf32>
    %38 = arith.addf %35, %37 : vector<2x512xf32>
    %39 = vector.extract_strided_slice %38 {offsets = [0, 0], sizes = [2, 128], strides = [1, 1]} : vector<2x512xf32> to vector<2x128xf32>
    %40 = arith.negf %39 : vector<2x128xf32>
    %41 = math.exp %40 : vector<2x128xf32>
    %cst_13 = arith.constant 1.000000e+00 : f32
    %42 = vector.broadcast %cst_13 : f32 to vector<2x128xf32>
    %43 = arith.addf %42, %41 : vector<2x128xf32>
    %44 = arith.divf %42, %43 : vector<2x128xf32>
    %45 = vector.extract_strided_slice %38 {offsets = [0, 128], sizes = [2, 128], strides = [1, 1]} : vector<2x512xf32> to vector<2x128xf32>
    %46 = arith.negf %45 : vector<2x128xf32>
    %47 = math.exp %46 : vector<2x128xf32>
    %cst_14 = arith.constant 1.000000e+00 : f32
    %48 = vector.broadcast %cst_14 : f32 to vector<2x128xf32>
    %49 = arith.addf %48, %47 : vector<2x128xf32>
    %50 = arith.divf %48, %49 : vector<2x128xf32>
    %51 = vector.extract_strided_slice %38 {offsets = [0, 256], sizes = [2, 128], strides = [1, 1]} : vector<2x512xf32> to vector<2x128xf32>
    %52 = math.tanh %51 : vector<2x128xf32>
    %53 = vector.extract_strided_slice %38 {offsets = [0, 384], sizes = [2, 128], strides = [1, 1]} : vector<2x512xf32> to vector<2x128xf32>
    %54 = arith.negf %53 : vector<2x128xf32>
    %55 = math.exp %54 : vector<2x128xf32>
    %cst_15 = arith.constant 1.000000e+00 : f32
    %56 = vector.broadcast %cst_15 : f32 to vector<2x128xf32>
    %57 = arith.addf %56, %55 : vector<2x128xf32>
    %58 = arith.divf %56, %57 : vector<2x128xf32>
    %59 = arith.mulf %50, %30 : vector<2x128xf32>
    %60 = arith.mulf %44, %52 : vector<2x128xf32>
    %61 = arith.addf %59, %60 : vector<2x128xf32>
    %62 = math.tanh %61 : vector<2x128xf32>
    %63 = arith.mulf %58, %62 : vector<2x128xf32>
    %c2_i32 = arith.constant 2 : i32
    %64 = arith.index_cast %c2_i32 : i32 to index
    %c0_16 = arith.constant 0 : index
    %c0_17 = arith.constant 0 : index
    %65 = vector.load %arg0[%64, %c0_16, %c0_17] : memref<8x2x512xf32, #tpu.memory_space<vmem>>, vector<1x2x512xf32>
    %66 = vector.shape_cast %65 : vector<1x2x512xf32> to vector<2x512xf32>
    %c0_18 = arith.constant 0 : index
    %c0_19 = arith.constant 0 : index
    %67 = vector.load %arg1[%c0_18, %c0_19] : memref<128x512xf32, #tpu.memory_space<vmem>>, vector<128x512xf32>
    %cst_20 = arith.constant dense<0.000000e+00> : vector<2x512xf32>
    %68 = tpu.matmul %63, %67, %cst_20 {dimension_numbers = #tpu.dot_dimension_numbers<[1], [0], [0], [1], [0, 0, 1, 1], [], []>} : vector<2x128xf32>, vector<128x512xf32>, vector<2x512xf32> -> vector<2x512xf32>
    %69 = arith.addf %66, %68 : vector<2x512xf32>
    %70 = vector.extract_strided_slice %69 {offsets = [0, 0], sizes = [2, 128], strides = [1, 1]} : vector<2x512xf32> to vector<2x128xf32>
    %71 = arith.negf %70 : vector<2x128xf32>
    %72 = math.exp %71 : vector<2x128xf32>
    %cst_21 = arith.constant 1.000000e+00 : f32
    %73 = vector.broadcast %cst_21 : f32 to vector<2x128xf32>
    %74 = arith.addf %73, %72 : vector<2x128xf32>
    %75 = arith.divf %73, %74 : vector<2x128xf32>
    %76 = vector.extract_strided_slice %69 {offsets = [0, 128], sizes = [2, 128], strides = [1, 1]} : vector<2x512xf32> to vector<2x128xf32>
    %77 = arith.negf %76 : vector<2x128xf32>
    %78 = math.exp %77 : vector<2x128xf32>
    %cst_22 = arith.constant 1.000000e+00 : f32
    %79 = vector.broadcast %cst_22 : f32 to vector<2x128xf32>
    %80 = arith.addf %79, %78 : vector<2x128xf32>
    %81 = arith.divf %79, %80 : vector<2x128xf32>
    %82 = vector.extract_strided_slice %69 {offsets = [0, 256], sizes = [2, 128], strides = [1, 1]} : vector<2x512xf32> to vector<2x128xf32>
    %83 = math.tanh %82 : vector<2x128xf32>
    %84 = vector.extract_strided_slice %69 {offsets = [0, 384], sizes = [2, 128], strides = [1, 1]} : vector<2x512xf32> to vector<2x128xf32>
    %85 = arith.negf %84 : vector<2x128xf32>
    %86 = math.exp %85 : vector<2x128xf32>
    %cst_23 = arith.constant 1.000000e+00 : f32
    %87 = vector.broadcast %cst_23 : f32 to vector<2x128xf32>
    %88 = arith.addf %87, %86 : vector<2x128xf32>
    %89 = arith.divf %87, %88 : vector<2x128xf32>
    %90 = arith.mulf %81, %61 : vector<2x128xf32>
    %91 = arith.mulf %75, %83 : vector<2x128xf32>
    %92 = arith.addf %90, %91 : vector<2x128xf32>
    %93 = math.tanh %92 : vector<2x128xf32>
    %94 = arith.mulf %89, %93 : vector<2x128xf32>
    %c3_i32 = arith.constant 3 : i32
    %95 = arith.index_cast %c3_i32 : i32 to index
    %c0_24 = arith.constant 0 : index
    %c0_25 = arith.constant 0 : index
    %96 = vector.load %arg0[%95, %c0_24, %c0_25] : memref<8x2x512xf32, #tpu.memory_space<vmem>>, vector<1x2x512xf32>
    %97 = vector.shape_cast %96 : vector<1x2x512xf32> to vector<2x512xf32>
    %c0_26 = arith.constant 0 : index
    %c0_27 = arith.constant 0 : index
    %98 = vector.load %arg1[%c0_26, %c0_27] : memref<128x512xf32, #tpu.memory_space<vmem>>, vector<128x512xf32>
    %cst_28 = arith.constant dense<0.000000e+00> : vector<2x512xf32>
    %99 = tpu.matmul %94, %98, %cst_28 {dimension_numbers = #tpu.dot_dimension_numbers<[1], [0], [0], [1], [0, 0, 1, 1], [], []>} : vector<2x128xf32>, vector<128x512xf32>, vector<2x512xf32> -> vector<2x512xf32>
    %100 = arith.addf %97, %99 : vector<2x512xf32>
    %101 = vector.extract_strided_slice %100 {offsets = [0, 0], sizes = [2, 128], strides = [1, 1]} : vector<2x512xf32> to vector<2x128xf32>
    %102 = arith.negf %101 : vector<2x128xf32>
    %103 = math.exp %102 : vector<2x128xf32>
    %cst_29 = arith.constant 1.000000e+00 : f32
    %104 = vector.broadcast %cst_29 : f32 to vector<2x128xf32>
    %105 = arith.addf %104, %103 : vector<2x128xf32>
    %106 = arith.divf %104, %105 : vector<2x128xf32>
    %107 = vector.extract_strided_slice %100 {offsets = [0, 128], sizes = [2, 128], strides = [1, 1]} : vector<2x512xf32> to vector<2x128xf32>
    %108 = arith.negf %107 : vector<2x128xf32>
    %109 = math.exp %108 : vector<2x128xf32>
    %cst_30 = arith.constant 1.000000e+00 : f32
    %110 = vector.broadcast %cst_30 : f32 to vector<2x128xf32>
    %111 = arith.addf %110, %109 : vector<2x128xf32>
    %112 = arith.divf %110, %111 : vector<2x128xf32>
    %113 = vector.extract_strided_slice %100 {offsets = [0, 256], sizes = [2, 128], strides = [1, 1]} : vector<2x512xf32> to vector<2x128xf32>
    %114 = math.tanh %113 : vector<2x128xf32>
    %115 = vector.extract_strided_slice %100 {offsets = [0, 384], sizes = [2, 128], strides = [1, 1]} : vector<2x512xf32> to vector<2x128xf32>
    %116 = arith.negf %115 : vector<2x128xf32>
    %117 = math.exp %116 : vector<2x128xf32>
    %cst_31 = arith.constant 1.000000e+00 : f32
    %118 = vector.broadcast %cst_31 : f32 to vector<2x128xf32>
    %119 = arith.addf %118, %117 : vector<2x128xf32>
    %120 = arith.divf %118, %119 : vector<2x128xf32>
    %121 = arith.mulf %112, %92 : vector<2x128xf32>
    %122 = arith.mulf %106, %114 : vector<2x128xf32>
    %123 = arith.addf %121, %122 : vector<2x128xf32>
    %124 = math.tanh %123 : vector<2x128xf32>
    %125 = arith.mulf %120, %124 : vector<2x128xf32>
    %c4_i32 = arith.constant 4 : i32
    %126 = arith.index_cast %c4_i32 : i32 to index
    %c0_32 = arith.constant 0 : index
    %c0_33 = arith.constant 0 : index
    %127 = vector.load %arg0[%126, %c0_32, %c0_33] : memref<8x2x512xf32, #tpu.memory_space<vmem>>, vector<1x2x512xf32>
    %128 = vector.shape_cast %127 : vector<1x2x512xf32> to vector<2x512xf32>
    %c0_34 = arith.constant 0 : index
    %c0_35 = arith.constant 0 : index
    %129 = vector.load %arg1[%c0_34, %c0_35] : memref<128x512xf32, #tpu.memory_space<vmem>>, vector<128x512xf32>
    %cst_36 = arith.constant dense<0.000000e+00> : vector<2x512xf32>
    %130 = tpu.matmul %125, %129, %cst_36 {dimension_numbers = #tpu.dot_dimension_numbers<[1], [0], [0], [1], [0, 0, 1, 1], [], []>} : vector<2x128xf32>, vector<128x512xf32>, vector<2x512xf32> -> vector<2x512xf32>
    %131 = arith.addf %128, %130 : vector<2x512xf32>
    %132 = vector.extract_strided_slice %131 {offsets = [0, 0], sizes = [2, 128], strides = [1, 1]} : vector<2x512xf32> to vector<2x128xf32>
    %133 = arith.negf %132 : vector<2x128xf32>
    %134 = math.exp %133 : vector<2x128xf32>
    %cst_37 = arith.constant 1.000000e+00 : f32
    %135 = vector.broadcast %cst_37 : f32 to vector<2x128xf32>
    %136 = arith.addf %135, %134 : vector<2x128xf32>
    %137 = arith.divf %135, %136 : vector<2x128xf32>
    %138 = vector.extract_strided_slice %131 {offsets = [0, 128], sizes = [2, 128], strides = [1, 1]} : vector<2x512xf32> to vector<2x128xf32>
    %139 = arith.negf %138 : vector<2x128xf32>
    %140 = math.exp %139 : vector<2x128xf32>
    %cst_38 = arith.constant 1.000000e+00 : f32
    %141 = vector.broadcast %cst_38 : f32 to vector<2x128xf32>
    %142 = arith.addf %141, %140 : vector<2x128xf32>
    %143 = arith.divf %141, %142 : vector<2x128xf32>
    %144 = vector.extract_strided_slice %131 {offsets = [0, 256], sizes = [2, 128], strides = [1, 1]} : vector<2x512xf32> to vector<2x128xf32>
    %145 = math.tanh %144 : vector<2x128xf32>
    %146 = vector.extract_strided_slice %131 {offsets = [0, 384], sizes = [2, 128], strides = [1, 1]} : vector<2x512xf32> to vector<2x128xf32>
    %147 = arith.negf %146 : vector<2x128xf32>
    %148 = math.exp %147 : vector<2x128xf32>
    %cst_39 = arith.constant 1.000000e+00 : f32
    %149 = vector.broadcast %cst_39 : f32 to vector<2x128xf32>
    %150 = arith.addf %149, %148 : vector<2x128xf32>
    %151 = arith.divf %149, %150 : vector<2x128xf32>
    %152 = arith.mulf %143, %123 : vector<2x128xf32>
    %153 = arith.mulf %137, %145 : vector<2x128xf32>
    %154 = arith.addf %152, %153 : vector<2x128xf32>
    %155 = math.tanh %154 : vector<2x128xf32>
    %156 = arith.mulf %151, %155 : vector<2x128xf32>
    %c5_i32 = arith.constant 5 : i32
    %157 = arith.index_cast %c5_i32 : i32 to index
    %c0_40 = arith.constant 0 : index
    %c0_41 = arith.constant 0 : index
    %158 = vector.load %arg0[%157, %c0_40, %c0_41] : memref<8x2x512xf32, #tpu.memory_space<vmem>>, vector<1x2x512xf32>
    %159 = vector.shape_cast %158 : vector<1x2x512xf32> to vector<2x512xf32>
    %c0_42 = arith.constant 0 : index
    %c0_43 = arith.constant 0 : index
    %160 = vector.load %arg1[%c0_42, %c0_43] : memref<128x512xf32, #tpu.memory_space<vmem>>, vector<128x512xf32>
    %cst_44 = arith.constant dense<0.000000e+00> : vector<2x512xf32>
    %161 = tpu.matmul %156, %160, %cst_44 {dimension_numbers = #tpu.dot_dimension_numbers<[1], [0], [0], [1], [0, 0, 1, 1], [], []>} : vector<2x128xf32>, vector<128x512xf32>, vector<2x512xf32> -> vector<2x512xf32>
    %162 = arith.addf %159, %161 : vector<2x512xf32>
    %163 = vector.extract_strided_slice %162 {offsets = [0, 0], sizes = [2, 128], strides = [1, 1]} : vector<2x512xf32> to vector<2x128xf32>
    %164 = arith.negf %163 : vector<2x128xf32>
    %165 = math.exp %164 : vector<2x128xf32>
    %cst_45 = arith.constant 1.000000e+00 : f32
    %166 = vector.broadcast %cst_45 : f32 to vector<2x128xf32>
    %167 = arith.addf %166, %165 : vector<2x128xf32>
    %168 = arith.divf %166, %167 : vector<2x128xf32>
    %169 = vector.extract_strided_slice %162 {offsets = [0, 128], sizes = [2, 128], strides = [1, 1]} : vector<2x512xf32> to vector<2x128xf32>
    %170 = arith.negf %169 : vector<2x128xf32>
    %171 = math.exp %170 : vector<2x128xf32>
    %cst_46 = arith.constant 1.000000e+00 : f32
    %172 = vector.broadcast %cst_46 : f32 to vector<2x128xf32>
    %173 = arith.addf %172, %171 : vector<2x128xf32>
    %174 = arith.divf %172, %173 : vector<2x128xf32>
    %175 = vector.extract_strided_slice %162 {offsets = [0, 256], sizes = [2, 128], strides = [1, 1]} : vector<2x512xf32> to vector<2x128xf32>
    %176 = math.tanh %175 : vector<2x128xf32>
    %177 = vector.extract_strided_slice %162 {offsets = [0, 384], sizes = [2, 128], strides = [1, 1]} : vector<2x512xf32> to vector<2x128xf32>
    %178 = arith.negf %177 : vector<2x128xf32>
    %179 = math.exp %178 : vector<2x128xf32>
    %cst_47 = arith.constant 1.000000e+00 : f32
    %180 = vector.broadcast %cst_47 : f32 to vector<2x128xf32>
    %181 = arith.addf %180, %179 : vector<2x128xf32>
    %182 = arith.divf %180, %181 : vector<2x128xf32>
    %183 = arith.mulf %174, %154 : vector<2x128xf32>
    %184 = arith.mulf %168, %176 : vector<2x128xf32>
    %185 = arith.addf %183, %184 : vector<2x128xf32>
    %186 = math.tanh %185 : vector<2x128xf32>
    %187 = arith.mulf %182, %186 : vector<2x128xf32>
    %c6_i32 = arith.constant 6 : i32
    %188 = arith.index_cast %c6_i32 : i32 to index
    %c0_48 = arith.constant 0 : index
    %c0_49 = arith.constant 0 : index
    %189 = vector.load %arg0[%188, %c0_48, %c0_49] : memref<8x2x512xf32, #tpu.memory_space<vmem>>, vector<1x2x512xf32>
    %190 = vector.shape_cast %189 : vector<1x2x512xf32> to vector<2x512xf32>
    %c0_50 = arith.constant 0 : index
    %c0_51 = arith.constant 0 : index
    %191 = vector.load %arg1[%c0_50, %c0_51] : memref<128x512xf32, #tpu.memory_space<vmem>>, vector<128x512xf32>
    %cst_52 = arith.constant dense<0.000000e+00> : vector<2x512xf32>
    %192 = tpu.matmul %187, %191, %cst_52 {dimension_numbers = #tpu.dot_dimension_numbers<[1], [0], [0], [1], [0, 0, 1, 1], [], []>} : vector<2x128xf32>, vector<128x512xf32>, vector<2x512xf32> -> vector<2x512xf32>
    %193 = arith.addf %190, %192 : vector<2x512xf32>
    %194 = vector.extract_strided_slice %193 {offsets = [0, 0], sizes = [2, 128], strides = [1, 1]} : vector<2x512xf32> to vector<2x128xf32>
    %195 = arith.negf %194 : vector<2x128xf32>
    %196 = math.exp %195 : vector<2x128xf32>
    %cst_53 = arith.constant 1.000000e+00 : f32
    %197 = vector.broadcast %cst_53 : f32 to vector<2x128xf32>
    %198 = arith.addf %197, %196 : vector<2x128xf32>
    %199 = arith.divf %197, %198 : vector<2x128xf32>
    %200 = vector.extract_strided_slice %193 {offsets = [0, 128], sizes = [2, 128], strides = [1, 1]} : vector<2x512xf32> to vector<2x128xf32>
    %201 = arith.negf %200 : vector<2x128xf32>
    %202 = math.exp %201 : vector<2x128xf32>
    %cst_54 = arith.constant 1.000000e+00 : f32
    %203 = vector.broadcast %cst_54 : f32 to vector<2x128xf32>
    %204 = arith.addf %203, %202 : vector<2x128xf32>
    %205 = arith.divf %203, %204 : vector<2x128xf32>
    %206 = vector.extract_strided_slice %193 {offsets = [0, 256], sizes = [2, 128], strides = [1, 1]} : vector<2x512xf32> to vector<2x128xf32>
    %207 = math.tanh %206 : vector<2x128xf32>
    %208 = vector.extract_strided_slice %193 {offsets = [0, 384], sizes = [2, 128], strides = [1, 1]} : vector<2x512xf32> to vector<2x128xf32>
    %209 = arith.negf %208 : vector<2x128xf32>
    %210 = math.exp %209 : vector<2x128xf32>
    %cst_55 = arith.constant 1.000000e+00 : f32
    %211 = vector.broadcast %cst_55 : f32 to vector<2x128xf32>
    %212 = arith.addf %211, %210 : vector<2x128xf32>
    %213 = arith.divf %211, %212 : vector<2x128xf32>
    %214 = arith.mulf %205, %185 : vector<2x128xf32>
    %215 = arith.mulf %199, %207 : vector<2x128xf32>
    %216 = arith.addf %214, %215 : vector<2x128xf32>
    %217 = math.tanh %216 : vector<2x128xf32>
    %218 = arith.mulf %213, %217 : vector<2x128xf32>
    %c7_i32 = arith.constant 7 : i32
    %219 = arith.index_cast %c7_i32 : i32 to index
    %c0_56 = arith.constant 0 : index
    %c0_57 = arith.constant 0 : index
    %220 = vector.load %arg0[%219, %c0_56, %c0_57] : memref<8x2x512xf32, #tpu.memory_space<vmem>>, vector<1x2x512xf32>
    %221 = vector.shape_cast %220 : vector<1x2x512xf32> to vector<2x512xf32>
    %c0_58 = arith.constant 0 : index
    %c0_59 = arith.constant 0 : index
    %222 = vector.load %arg1[%c0_58, %c0_59] : memref<128x512xf32, #tpu.memory_space<vmem>>, vector<128x512xf32>
    %cst_60 = arith.constant dense<0.000000e+00> : vector<2x512xf32>
    %223 = tpu.matmul %218, %222, %cst_60 {dimension_numbers = #tpu.dot_dimension_numbers<[1], [0], [0], [1], [0, 0, 1, 1], [], []>} : vector<2x128xf32>, vector<128x512xf32>, vector<2x512xf32> -> vector<2x512xf32>
    %224 = arith.addf %221, %223 : vector<2x512xf32>
    %225 = vector.extract_strided_slice %224 {offsets = [0, 0], sizes = [2, 128], strides = [1, 1]} : vector<2x512xf32> to vector<2x128xf32>
    %226 = arith.negf %225 : vector<2x128xf32>
    %227 = math.exp %226 : vector<2x128xf32>
    %cst_61 = arith.constant 1.000000e+00 : f32
    %228 = vector.broadcast %cst_61 : f32 to vector<2x128xf32>
    %229 = arith.addf %228, %227 : vector<2x128xf32>
    %230 = arith.divf %228, %229 : vector<2x128xf32>
    %231 = vector.extract_strided_slice %224 {offsets = [0, 128], sizes = [2, 128], strides = [1, 1]} : vector<2x512xf32> to vector<2x128xf32>
    %232 = arith.negf %231 : vector<2x128xf32>
    %233 = math.exp %232 : vector<2x128xf32>
    %cst_62 = arith.constant 1.000000e+00 : f32
    %234 = vector.broadcast %cst_62 : f32 to vector<2x128xf32>
    %235 = arith.addf %234, %233 : vector<2x128xf32>
    %236 = arith.divf %234, %235 : vector<2x128xf32>
    %237 = vector.extract_strided_slice %224 {offsets = [0, 256], sizes = [2, 128], strides = [1, 1]} : vector<2x512xf32> to vector<2x128xf32>
    %238 = math.tanh %237 : vector<2x128xf32>
    %239 = vector.extract_strided_slice %224 {offsets = [0, 384], sizes = [2, 128], strides = [1, 1]} : vector<2x512xf32> to vector<2x128xf32>
    %240 = arith.negf %239 : vector<2x128xf32>
    %241 = math.exp %240 : vector<2x128xf32>
    %cst_63 = arith.constant 1.000000e+00 : f32
    %242 = vector.broadcast %cst_63 : f32 to vector<2x128xf32>
    %243 = arith.addf %242, %241 : vector<2x128xf32>
    %244 = arith.divf %242, %243 : vector<2x128xf32>
    %245 = arith.mulf %236, %216 : vector<2x128xf32>
    %246 = arith.mulf %230, %238 : vector<2x128xf32>
    %247 = arith.addf %245, %246 : vector<2x128xf32>
    %248 = math.tanh %247 : vector<2x128xf32>
    %249 = arith.mulf %244, %248 : vector<2x128xf32>
    %c8_i32 = arith.constant 8 : i32
    %c0_64 = arith.constant 0 : index
    %c0_65 = arith.constant 0 : index
    %250 = vector.load %arg2[%c0_64, %c0_65] : memref<128x1xf32, #tpu.memory_space<vmem>>, vector<128x1xf32>
    %cst_66 = arith.constant dense<0.000000e+00> : vector<2x1xf32>
    %251 = tpu.matmul %249, %250, %cst_66 {dimension_numbers = #tpu.dot_dimension_numbers<[1], [0], [0], [1], [0, 0, 1, 1], [], []>} : vector<2x128xf32>, vector<128x1xf32>, vector<2x1xf32> -> vector<2x1xf32>
    %c0_67 = arith.constant 0 : index
    %c0_68 = arith.constant 0 : index
    %252 = vector.load %arg3[%c0_67, %c0_68] : memref<1x1xf32, #tpu.memory_space<vmem>>, vector<1x1xf32>
    %253 = vector.broadcast %252 : vector<1x1xf32> to vector<2x1xf32>
    %254 = arith.addf %251, %253 : vector<2x1xf32>
    %c0_69 = arith.constant 0 : index
    %c0_70 = arith.constant 0 : index
    %255 = vector.load %arg4[%c0_69, %c0_70] : memref<2x1xf32, #tpu.memory_space<vmem>>, vector<2x1xf32>
    tpu.vector_store %arg4[%c0_69, %c0_70], %254 {strides = array<i32>} : memref<2x1xf32, #tpu.memory_space<vmem>>, vector<2x1xf32>,
    return
  }
}

</mosaic_0001>

<bundles_post_ra>
// kernel: weather_forecaster.1
= control target key start
LH: loop header
LB: loop body
LE: loop exit
PB: predicated region body
PF: predicated region fallthrough
CT: control target
= control target key end

     0   :  { %s3066_s0 = inlined_call_operand.vmem [shape: f32[8,2,512], index: 0, kind: input, shape index: {}]   ;;  %s3067_s1 = inlined_call_operand.hbm [shape: f32[128,512], index: 1, kind: input, shape index: {}]   ;;  %s3068_s2 = inlined_call_operand.vmem [shape: f32[128,1], index: 2, kind: input, shape index: {}]   ;;  %s3069_s3 = inlined_call_operand.<no memory space> [shape: f32[1,1], index: 3, kind: input, shape index: {}]   ;;  %s3070_s4 = inlined_call_operand.vmem [shape: f32[2,1], index: 4, kind: output, shape index: {}]  }
   0x1   :  { %v9_v0 = vstv %s3069_s3 }
   0x2   :  { %10 = vst [vmem:[#allocation2] sm:$0x1] %v9_v0 }
   0x3   :  { %11 = vsyncpa [#allocation4], 0  ;;  %s2559_s17 = smov [#allocation3]   ;;  %s2535_s21 = scalar_lea.hbm %s3067_s1, 8192 }
   0x4   :  { %s19_s18 = sshll.u32 %s2559_s17, 4  ;;  %p2536_p0 = scmp.ne.s32.totalorder %s3067_s1, %s2535_s21  ;;  %s20_s18 = int_to_ptr.vmem [resolvable:$true] %s19_s18 }
   0x5   :  { %p2539_p1 = scmp.lt.u32.totalorder %s2535_s21, %s3067_s1 }
   0x7   :  { %p2541_p2 = pnand %p2539_p1, %p2536_p0 }
   0x9   :  { %2544 = shalt.err (!%p2541_p2)
}
   0xa   :  { %s2545_s3 = scalar_lea.vmem %s20_s18, 8192  ;;  %p2550_p4 = scmp.lt.s32.totalorder %s20_s18, %s20_s18 }
   0xb   :  { %p2546_p3 = scmp.ne.s32.totalorder %s20_s18, %s2545_s3  ;;  %p2551_p5 = scmp.lt.s32.totalorder %s2545_s3, %s2545_s3 }
   0xd   :  { %p2552_p6 = por %p2551_p5, %p2550_p4 }
   0xf   :  { %p2553_p7 = pnand %p2552_p6, %p2546_p3 }
  0x11   :  { %2556 = shalt.err (!%p2553_p7)
}
  0x12   :  { %s2560_s26 = smov 512   ;;  %s2561_s27 = smov 32  }
  0x13   :  { %25 = dma.hbm_to_vmem [thread:$0]  %s3067_s1, 8192, %s20_s18, [#allocation4], %s2560_s26, %s2560_s26, %s2561_s27  }
  0x14   :  { %2557 = dma.done.wait [#allocation4], 8192  }
  0x15   :  { %2558 = vsyncadd [#allocation4], 4294959104  ;;  %v2562_v1 = vmov 0.0   ;;  %v35_v2 = vld [vmem:[#allocation3 + $0x8] sm:$0xff]  ;;  %v37_v4 = vld [vmem:[#allocation3 + $0x18] sm:$0xff]  ;;  %vm2565_vm0 = vmmov 0  }
  0x16   :  { %162 = vmatprep.mubr.f32.mxu0 %v2562_v1  ;;  %233 = vmatprep.mubr.f32.mxu1 %v2562_v1  ;;  %v39_v3 = vld [vmem:[#allocation3 + $0x28] sm:$0xff]  ;;  %v41_v6 = vld [vmem:[#allocation3 + $0x38] sm:$0xff]  ;;  %v34_v7 = vld [vmem:[#allocation3] sm:$0xff]  ;;  %vm1773_vm1 = vcmask 1024  }
  0x17   :  { %v2608_v5 = vpack.c.bf16 %v39_v3, %v35_v2  ;;  %v38_v8 = vld [vmem:[#allocation3 + $0x20] sm:$0xff]  ;;  %v2610_v9 = vpack.c.bf16 %v41_v6, %v37_v4  ;;  %v36_v11 = vld [vmem:[#allocation3 + $0x10] sm:$0xff]  ;;  %v43_v13 = vld [vmem:[#allocation3 + $0x48] sm:$0xff] }
  0x18   :  { %v2612_v10 = vpack.c.bf16 %v38_v8, %v34_v7  ;;  %v40_v12 = vld [vmem:[#allocation3 + $0x30] sm:$0xff]  ;;  %v47_v15 = vld [vmem:[#allocation3 + $0x68] sm:$0xff]  ;;  %v45_v16 = vld [vmem:[#allocation3 + $0x58] sm:$0xff] }
  0x19   :  { %1865 = vmatprep.subr.bf16.mxu0 %v2608_v5  ;;  %v2615_v14 = vpack.c.bf16 %v40_v12, %v36_v11  ;;  %v49_v17 = vld [vmem:[#allocation3 + $0x78] sm:$0xff]  ;;  %1897 = vmatprep.subr.bf16.mxu1 %v2610_v9  ;;  %v2619_v18 = vpack.c.bf16 %v47_v15, %v43_v13  ;;  %v42_v20 = vld [vmem:[#allocation3 + $0x40] sm:$0xff]  ;;  %v44_v22 = vld [vmem:[#allocation3 + $0x50] sm:$0xff] }
  0x1a   :  { %1867 = vmatpush1.bf16.msra.mxu0 %v2612_v10  ;;  %v2621_v19 = vpack.c.bf16 %v49_v17, %v45_v16  ;;  %v46_v21 = vld [vmem:[#allocation3 + $0x60] sm:$0xff]  ;;  %v48_v24 = vld [vmem:[#allocation3 + $0x70] sm:$0xff]  ;;  %v51_v25 = vld [vmem:[#allocation3 + $0x88] sm:$0xff] }
  0x1b   :  { %1899 = vmatpush1.bf16.msra.mxu1 %v2615_v14  ;;  %v2624_v23 = vpack.c.bf16 %v46_v21, %v42_v20  ;;  %v55_v26 = vld [vmem:[#allocation3 + $0xa8] sm:$0xff]  ;;  %1869 = vmatprep.subr.bf16.mxu0 %v2619_v18  ;;  %v2628_v27 = vpack.c.bf16 %v48_v24, %v44_v22  ;;  %v53_v29 = vld [vmem:[#allocation3 + $0x98] sm:$0xff]  ;;  %v50_v31 = vld [vmem:[#allocation3 + $0x80] sm:$0xff] }
  0x1c   :  { %1901 = vmatprep.subr.bf16.mxu1 %v2621_v19  ;;  %v2630_v28 = vpack.c.bf16 %v55_v26, %v51_v25  ;;  %v57_v30 = vld [vmem:[#allocation3 + $0xb8] sm:$0xff]  ;;  %v54_v33 = vld [vmem:[#allocation3 + $0xa0] sm:$0xff]  ;;  %v52_v34 = vld [vmem:[#allocation3 + $0x90] sm:$0xff] }
  0x1d   :  { %v2632_v32 = vpack.c.bf16 %v57_v30, %v53_v29  ;;  %v56_v35 = vld [vmem:[#allocation3 + $0xb0] sm:$0xff]  ;;  %v2635_v36 = vpack.c.bf16 %v54_v33, %v50_v31  ;;  %v59_v37 = vld [vmem:[#allocation3 + $0xc8] sm:$0xff]  ;;  %v61_v39 = vld [vmem:[#allocation3 + $0xd8] sm:$0xff] }
  0x1e   :  { %1871 = vmatpush1.bf16.msra.mxu0 %v2624_v23  ;;  %v63_v38 = vld [vmem:[#allocation3 + $0xe8] sm:$0xff]  ;;  %v2639_v40 = vpack.c.bf16 %v56_v35, %v52_v34  ;;  %v65_v42 = vld [vmem:[#allocation3 + $0xf8] sm:$0xff]  ;;  %v58_v43 = vld [vmem:[#allocation3 + $0xc0] sm:$0xff] }
  0x1f   :  { %1903 = vmatpush1.bf16.msra.mxu1 %v2628_v27  ;;  %1873 = vmatprep.subr.bf16.mxu0 %v2630_v28  ;;  %v2641_v41 = vpack.c.bf16 %v63_v38, %v59_v37  ;;  %v62_v44 = vld [vmem:[#allocation3 + $0xe0] sm:$0xff]  ;;  %v2644_v45 = vpack.c.bf16 %v65_v42, %v61_v39  ;;  %v60_v46 = vld [vmem:[#allocation3 + $0xd0] sm:$0xff]  ;;  %v67_v48 = vld [vmem:[#allocation3 + $0x108] sm:$0xff] }
  0x20   :  { %1905 = vmatprep.subr.bf16.mxu1 %v2632_v32  ;;  %v64_v47 = vld [vmem:[#allocation3 + $0xf0] sm:$0xff]  ;;  %v71_v49 = vld [vmem:[#allocation3 + $0x128] sm:$0xff]  ;;  %v69_v50 = vld [vmem:[#allocation3 + $0x118] sm:$0xff]  ;;  %v2647_v52 = vpack.c.bf16 %v62_v44, %v58_v43 }
  0x21   :  { %v73_v51 = vld [vmem:[#allocation3 + $0x138] sm:$0xff]  ;;  %v2651_v53 = vpack.c.bf16 %v64_v47, %v60_v46  ;;  %v2653_v54 = vpack.c.bf16 %v71_v49, %v67_v48  ;;  %v66_v55 = vld [vmem:[#allocation3 + $0x100] sm:$0xff]  ;;  %v68_v57 = vld [vmem:[#allocation3 + $0x110] sm:$0xff]  ;;  %v2563_v49 = vmov 1983009808  }
  0x22   :  { %1875 = vmatpush1.bf16.msra.mxu0 %v2635_v36  ;;  %v70_v56 = vld [vmem:[#allocation3 + $0x120] sm:$0xff]  ;;  %v2656_v58 = vpack.c.bf16 %v73_v51, %v69_v50  ;;  %v72_v59 = vld [vmem:[#allocation3 + $0x130] sm:$0xff]  ;;  %v75_v60 = vld [vmem:[#allocation3 + $0x148] sm:$0xff]  ;;  %v247_v50 = vunpack.c.l.s4 %v2563_v49  ;;  %v249_v51 = vlaneseq }
  0x23   :  { %1907 = vmatpush1.bf16.msra.mxu1 %v2639_v40  ;;  %1877 = vmatprep.subr.bf16.mxu0 %v2641_v41  ;;  %v79_v61 = vld [vmem:[#allocation3 + $0x168] sm:$0xff]  ;;  %v77_v62 = vld [vmem:[#allocation3 + $0x158] sm:$0xff]  ;;  %v2659_v0 = vpack.c.bf16 %v70_v56, %v66_v55  ;;  %v2663_v2 = vpack.c.bf16 %v72_v59, %v68_v57  ;;  %v74_v4 = vld [vmem:[#allocation3 + $0x140] sm:$0xff] }
  0x24   :  { %1909 = vmatprep.subr.bf16.mxu1 %v2644_v45  ;;  %v81_v63 = vld [vmem:[#allocation3 + $0x178] sm:$0xff]  ;;  %v2665_v3 = vpack.c.bf16 %v79_v61, %v75_v60  ;;  %v78_v6 = vld [vmem:[#allocation3 + $0x160] sm:$0xff]  ;;  %v76_v7 = vld [vmem:[#allocation3 + $0x150] sm:$0xff]  ;;  %v248_v55 = vunpack.c.0.s8 %v247_v50  ;;  %v250_v56 = vshrl.u32 %v249_v51, 7 }
  0x25   :  { %v2668_v8 = vpack.c.bf16 %v81_v63, %v77_v62  ;;  %v80_v11 = vld [vmem:[#allocation3 + $0x170] sm:$0xff]  ;;  %v83_v12 = vld [vmem:[#allocation3 + $0x188] sm:$0xff]  ;;  %v85_v15 = vld [vmem:[#allocation3 + $0x198] sm:$0xff]  ;;  %v2671_v17 = vpack.c.bf16 %v78_v6, %v74_v4 }
  0x26   :  { %1879 = vmatpush1.bf16.msra.mxu0 %v2647_v52  ;;  %v87_v13 = vld [vmem:[#allocation3 + $0x1a8] sm:$0xff]  ;;  %v89_v16 = vld [vmem:[#allocation3 + $0x1b8] sm:$0xff]  ;;  %v2675_v20 = vpack.c.bf16 %v80_v11, %v76_v7  ;;  %v82_v22 = vld [vmem:[#allocation3 + $0x180] sm:$0xff]  ;;  %v2742_v59 = vsub.s32 %v248_v55, %v250_v56 }
  0x27   :  { %1911 = vmatpush1.bf16.msra.mxu1 %v2651_v53  ;;  %1881 = vmatprep.subr.bf16.mxu0 %v2653_v54  ;;  %v2677_v21 = vpack.c.bf16 %v87_v13, %v83_v12  ;;  %v86_v24 = vld [vmem:[#allocation3 + $0x1a0] sm:$0xff]  ;;  %v84_v25 = vld [vmem:[#allocation3 + $0x190] sm:$0xff]  ;;  %v2680_v26 = vpack.c.bf16 %v89_v16, %v85_v15  ;;  %v91_v30 = vld [vmem:[#allocation3 + $0x1c8] sm:$0xff] }
  0x28   :  { %1913 = vmatprep.subr.bf16.mxu1 %v2656_v58  ;;  %v88_v29 = vld [vmem:[#allocation3 + $0x1b0] sm:$0xff]  ;;  %v95_v31 = vld [vmem:[#allocation3 + $0x1e8] sm:$0xff]  ;;  %v93_v33 = vld [vmem:[#allocation3 + $0x1d8] sm:$0xff]  ;;  %v2683_v35 = vpack.c.bf16 %v86_v24, %v82_v22 }
  0x29   :  { %v97_v34 = vld [vmem:[#allocation3 + $0x1f8] sm:$0xff]  ;;  %v2687_v37 = vpack.c.bf16 %v88_v29, %v84_v25  ;;  %v2689_v38 = vpack.c.bf16 %v95_v31, %v91_v30  ;;  %v90_v39 = vld [vmem:[#allocation3 + $0x1c0] sm:$0xff]  ;;  %v92_v44 = vld [vmem:[#allocation3 + $0x1d0] sm:$0xff] }
  0x2a   :  { %1883 = vmatpush1.bf16.msra.mxu0 %v2659_v0  ;;  %v94_v42 = vld [vmem:[#allocation3 + $0x1e0] sm:$0xff]  ;;  %v2692_v43 = vpack.c.bf16 %v97_v34, %v93_v33  ;;  %v96_v46 = vld [vmem:[#allocation3 + $0x1f0] sm:$0xff] }
  0x2b   :  { %1915 = vmatpush1.bf16.msra.mxu1 %v2663_v2  ;;  %1885 = vmatprep.subr.bf16.mxu0 %v2665_v3  ;;  %v2695_v47 = vpack.c.bf16 %v94_v42, %v90_v39  ;;  %v2699_v48 = vpack.c.bf16 %v96_v46, %v92_v44  ;;  %v33_v11 = vld [vmem:[%s3066_s0] sm:$0xff] }
  0x2c   :  { %1917 = vmatprep.subr.bf16.mxu1 %v2668_v8 }
  0x2e   :  { %1887 = vmatpush1.bf16.msra.mxu0 %v2671_v17 }
  0x2f   :  { %1919 = vmatpush1.bf16.msra.mxu1 %v2675_v20  ;;  %1889 = vmatprep.subr.bf16.mxu0 %v2677_v21 }
  0x30   :  { %1921 = vmatprep.subr.bf16.mxu1 %v2680_v26 }
  0x32   :  { %1891 = vmatpush1.bf16.msra.mxu0 %v2683_v35 }
  0x33   :  { %1923 = vmatpush1.bf16.msra.mxu1 %v2687_v37  ;;  %1893 = vmatprep.subr.bf16.mxu0 %v2689_v38 }
  0x34   :  { %1925 = vmatprep.subr.bf16.mxu1 %v2692_v43 }
  0x36   :  { %1895 = vmatpush1.bf16.msra.mxu0 %v2695_v47 }
  0x37   :  { %1927 = vmatpush1.bf16.msra.mxu1 %v2699_v48  ;;  %1929 = vmatprep.subr.bf16.mxu0 %v2608_v5 }
  0x38   :  { %1961 = vmatprep.subr.bf16.mxu1 %v2610_v9 }
  0x39   :  { %163 = vmatmul.mubr.f32.vlgmr.msra.gmra.mrb[0].mxu0 %v2562_v1 }
  0x3a   :  { %234 = vmatmul.mubr.f32.vlgmr.msra.gmra.mrb[0].mxu1 %v2562_v1  ;;  %1931 = vmatpush1.bf16.msra.mxu0 %v2612_v10 }
  0x3b   :  { %1963 = vmatpush1.bf16.msra.mxu1 %v2615_v14  ;;  %1933 = vmatprep.subr.bf16.mxu0 %v2619_v18 }
  0x3c   :  { %1965 = vmatprep.subr.bf16.mxu1 %v2621_v19  ;;  %360 = vmatprep.mubr.f32.mxu0 %v2562_v1 }
  0x3d   :  { %431 = vmatprep.mubr.f32.mxu1 %v2562_v1 }
  0x3e   :  { %1935 = vmatpush1.bf16.msra.mxu0 %v2624_v23 }
  0x3f   :  { %1967 = vmatpush1.bf16.msra.mxu1 %v2628_v27  ;;  %1937 = vmatprep.subr.bf16.mxu0 %v2630_v28 }
  0x40   :  { %1969 = vmatprep.subr.bf16.mxu1 %v2632_v32 }
  0x42   :  { %1939 = vmatpush1.bf16.msra.mxu0 %v2635_v36 }
  0x43   :  { %1971 = vmatpush1.bf16.msra.mxu1 %v2639_v40  ;;  %1941 = vmatprep.subr.bf16.mxu0 %v2641_v41 }
  0x44   :  { %1973 = vmatprep.subr.bf16.mxu1 %v2644_v45 }
  0x46   :  { %1943 = vmatpush1.bf16.msra.mxu0 %v2647_v52 }
  0x47   :  { %1975 = vmatpush1.bf16.msra.mxu1 %v2651_v53  ;;  %1945 = vmatprep.subr.bf16.mxu0 %v2653_v54 }
  0x48   :  { %1977 = vmatprep.subr.bf16.mxu1 %v2656_v58 }
  0x4a   :  { %1947 = vmatpush1.bf16.msra.mxu0 %v2659_v0 }
  0x4b   :  { %1979 = vmatpush1.bf16.msra.mxu1 %v2663_v2  ;;  %1949 = vmatprep.subr.bf16.mxu0 %v2665_v3 }
  0x4c   :  { %1981 = vmatprep.subr.bf16.mxu1 %v2668_v8 }
  0x4e   :  { %1951 = vmatpush1.bf16.msra.mxu0 %v2671_v17 }
  0x4f   :  { %1983 = vmatpush1.bf16.msra.mxu1 %v2675_v20  ;;  %1953 = vmatprep.subr.bf16.mxu0 %v2677_v21 }
  0x50   :  { %1985 = vmatprep.subr.bf16.mxu1 %v2680_v26 }
  0x52   :  { %1955 = vmatpush1.bf16.msra.mxu0 %v2683_v35 }
  0x53   :  { %1987 = vmatpush1.bf16.msra.mxu1 %v2687_v37  ;;  %1957 = vmatprep.subr.bf16.mxu0 %v2689_v38 }
  0x54   :  { %1989 = vmatprep.subr.bf16.mxu1 %v2692_v43 }
  0x56   :  { %1959 = vmatpush1.bf16.msra.mxu0 %v2695_v47 }
  0x57   :  { %1991 = vmatpush1.bf16.msra.mxu1 %v2699_v48  ;;  %1993 = vmatprep.subr.bf16.mxu0 %v2608_v5 }
  0x58   :  { %2025 = vmatprep.subr.bf16.mxu1 %v2610_v9 }
 0x10c   :  { %v164_v57 = vpop.f32.mrb[0].mxu0 }
 0x10d   :  { %v235_v60 = vpop.f32.mrb[0].mxu1  ;;  %v166_v61 = vpop.f32.mrb[1].mxu0 }
 0x10e   :  { %v244_v62 = vcombine.low %v164_v57, %v166_v61  ;;  %v237_v63 = vpop.f32.mrb[1].mxu1 }
 0x10f   :  { %v245_v4 = vcombine.low %v235_v60, %v237_v63 }
 0x110   :  { %v252_v6 = vrot.slane %v244_v62, %v2742_v59 }
 0x111   :  { %v259_v7 = vrot.slane %v245_v4, %v2742_v59 }
 0x113   :  { %v260_v12 = vcombine.low %v252_v6, %v259_v7 }
 0x115   :  { %v262_v13 = vadd.f32 %v260_v12, %v33_v11 }
 0x117   :  { %v1780_v15 = vmul.f32 -1.442695, %v262_v13  ;;  %v270_v16 = vrot.slane %v262_v13, 2  ;;  %v281_v24 = vrot.slane %v262_v13, 6  ;;  %v278_v30 = vrot.slane %v262_v13, 4  ;;  %v1783_v13 = vld [vmem:[%s3066_s0 + $0x8] sm:$0xff] }
 0x119   :  { %2407 = vpow2.f32 %v1780_v15  ;;  %v1781_v22 = vmul.f32 -1.442695, %v270_v16  ;;  %v1782_v25 = vmul.f32 -1.442695, %v281_v24 }
 0x11b   :  { %2409 = vpow2.f32 %v1781_v22 }
 0x11c   :  { %2411 = vpow2.f32 %v1782_v25 }
 0x123   :  { %v2408_v29 = vpop.eup %2407 }
 0x124   :  { %v266_v31 = vadd.f32 1.0, %v2408_v29 }
 0x125   :  { %v2410_v33 = vpop.eup %2409 }
 0x126   :  { %2413 = vrcp.f32 %v266_v31  ;;  %v275_v34 = vadd.f32 1.0, %v2410_v33  ;;  %v2412_v39 = vpop.eup %2411 }
 0x127   :  { %2415 = vtanh.f32 %v278_v30  ;;  %v286_v49 = vadd.f32 1.0, %v2412_v39 }
 0x128   :  { %2417 = vrcp.f32 %v275_v34 }
 0x129   :  { %2419 = vrcp.f32 %v286_v49 }
 0x130   :  { %v2414_v42 = vpop.eup %2413 }
 0x131   :  { %v2416_v44 = vpop.eup %2415 }
 0x132   :  { %v2418_v46 = vpop.eup %2417  ;;  %v290_v51 = vmul.f32 %v2416_v44, %v2414_v42 }
 0x133   :  { %v289_v50 = vmul.f32 0.0, %v2418_v46  ;;  %v2420_v56 = vpop.eup %2419 }
 0x135   :  { %v2749_v55 = vadd.f32 %v290_v51, %v289_v50 }
 0x137   :  { %2421 = vtanh.f32 %v2749_v55 }
 0x141   :  { %v2422_v57 = vpop.eup %2421 }
 0x142   :  { %v293_v60 = vmul.f32 %v2422_v57, %v2420_v56 }
 0x144   :  { %361 = vmatmul.mubr.f32.vlgmr.msra.gmra.mrb[2].mxu0 %v293_v60  ;;  %432 = vmatmul.mubr.f32.vlgmr.msra.gmra.mrb[2].mxu1 %v293_v60 }
 0x145   :  { %1995 = vmatpush1.bf16.msra.mxu0 %v2612_v10  ;;  %2027 = vmatpush1.bf16.msra.mxu1 %v2615_v14 }
 0x146   :  { %1997 = vmatprep.subr.bf16.mxu0 %v2619_v18  ;;  %2029 = vmatprep.subr.bf16.mxu1 %v2621_v19 }
 0x147   :  { %558 = vmatprep.mubr.f32.mxu0 %v2562_v1  ;;  %629 = vmatprep.mubr.f32.mxu1 %v2562_v1 }
 0x149   :  { %1999 = vmatpush1.bf16.msra.mxu0 %v2624_v23  ;;  %2031 = vmatpush1.bf16.msra.mxu1 %v2628_v27 }
 0x14a   :  { %2001 = vmatprep.subr.bf16.mxu0 %v2630_v28  ;;  %2033 = vmatprep.subr.bf16.mxu1 %v2632_v32 }
 0x14d   :  { %2003 = vmatpush1.bf16.msra.mxu0 %v2635_v36  ;;  %2035 = vmatpush1.bf16.msra.mxu1 %v2639_v40 }
 0x14e   :  { %2005 = vmatprep.subr.bf16.mxu0 %v2641_v41  ;;  %2037 = vmatprep.subr.bf16.mxu1 %v2644_v45 }
 0x151   :  { %2007 = vmatpush1.bf16.msra.mxu0 %v2647_v52  ;;  %2039 = vmatpush1.bf16.msra.mxu1 %v2651_v53 }
 0x152   :  { %2009 = vmatprep.subr.bf16.mxu0 %v2653_v54  ;;  %2041 = vmatprep.subr.bf16.mxu1 %v2656_v58 }
 0x155   :  { %2011 = vmatpush1.bf16.msra.mxu0 %v2659_v0  ;;  %2043 = vmatpush1.bf16.msra.mxu1 %v2663_v2 }
 0x156   :  { %2013 = vmatprep.subr.bf16.mxu0 %v2665_v3  ;;  %2045 = vmatprep.subr.bf16.mxu1 %v2668_v8 }
 0x159   :  { %2015 = vmatpush1.bf16.msra.mxu0 %v2671_v17  ;;  %2047 = vmatpush1.bf16.msra.mxu1 %v2675_v20 }
 0x15a   :  { %2017 = vmatprep.subr.bf16.mxu0 %v2677_v21  ;;  %2049 = vmatprep.subr.bf16.mxu1 %v2680_v26 }
 0x15d   :  { %2019 = vmatpush1.bf16.msra.mxu0 %v2683_v35  ;;  %2051 = vmatpush1.bf16.msra.mxu1 %v2687_v37 }
 0x15e   :  { %2021 = vmatprep.subr.bf16.mxu0 %v2689_v38  ;;  %2053 = vmatprep.subr.bf16.mxu1 %v2692_v43 }
 0x161   :  { %2023 = vmatpush1.bf16.msra.mxu0 %v2695_v47  ;;  %2055 = vmatpush1.bf16.msra.mxu1 %v2699_v48 }
 0x162   :  { %2057 = vmatprep.subr.bf16.mxu0 %v2608_v5  ;;  %2089 = vmatprep.subr.bf16.mxu1 %v2610_v9 }
 0x217   :  { %v362_v61 = vpop.f32.mrb[2].mxu0  ;;  %v433_v62 = vpop.f32.mrb[2].mxu1 }
 0x218   :  { %v364_v63 = vpop.f32.mrb[3].mxu0  ;;  %v435_v4 = vpop.f32.mrb[3].mxu1 }
 0x219   :  { %v442_v6 = vcombine.low %v362_v61, %v364_v63  ;;  %v443_v7 = vcombine.low %v433_v62, %v435_v4 }
 0x21b   :  { %v450_v11 = vrot.slane %v442_v6, %v2742_v59  ;;  %v457_v12 = vrot.slane %v443_v7, %v2742_v59 }
 0x21d   :  { %v458_v15 = vcombine.low %v450_v11, %v457_v12 }
 0x21f   :  { %v460_v16 = vadd.f32 %v1783_v13, %v458_v15 }
 0x221   :  { %v1784_v22 = vmul.f32 -1.442695, %v460_v16  ;;  %v468_v24 = vrot.slane %v460_v16, 2  ;;  %v479_v29 = vrot.slane %v460_v16, 6  ;;  %v476_v33 = vrot.slane %v460_v16, 4  ;;  %v1787_v16 = vld [vmem:[%s3066_s0 + $0x10] sm:$0xff] }
 0x223   :  { %2423 = vpow2.f32 %v1784_v22  ;;  %v1785_v25 = vmul.f32 -1.442695, %v468_v24  ;;  %v1786_v30 = vmul.f32 -1.442695, %v479_v29 }
 0x225   :  { %2425 = vpow2.f32 %v1785_v25 }
 0x226   :  { %2427 = vpow2.f32 %v1786_v30 }
 0x22d   :  { %v2424_v31 = vpop.eup %2423 }
 0x22e   :  { %v464_v34 = vadd.f32 1.0, %v2424_v31 }
 0x22f   :  { %v2426_v39 = vpop.eup %2425 }
 0x230   :  { %2429 = vrcp.f32 %v464_v34  ;;  %v473_v42 = vadd.f32 1.0, %v2426_v39  ;;  %v2428_v44 = vpop.eup %2427 }
 0x231   :  { %2431 = vtanh.f32 %v476_v33  ;;  %v484_v51 = vadd.f32 1.0, %v2428_v44 }
 0x232   :  { %2433 = vrcp.f32 %v473_v42 }
 0x233   :  { %2435 = vrcp.f32 %v484_v51 }
 0x23a   :  { %v2430_v46 = vpop.eup %2429 }
 0x23b   :  { %v2432_v49 = vpop.eup %2431 }
 0x23c   :  { %v2434_v50 = vpop.eup %2433  ;;  %v488_v57 = vmul.f32 %v2432_v49, %v2430_v46 }
 0x23d   :  { %v487_v56 = vmul.f32 %v2434_v50, %v2749_v55  ;;  %v2436_v61 = vpop.eup %2435 }
 0x23f   :  { %v2792_v60 = vadd.f32 %v488_v57, %v487_v56 }
 0x241   :  { %2437 = vtanh.f32 %v2792_v60 }
 0x24b   :  { %v2438_v62 = vpop.eup %2437 }
 0x24c   :  { %v491_v63 = vmul.f32 %v2438_v62, %v2436_v61 }
 0x24e   :  { %559 = vmatmul.mubr.f32.vlgmr.msra.gmra.mrb[4].mxu0 %v491_v63  ;;  %630 = vmatmul.mubr.f32.vlgmr.msra.gmra.mrb[4].mxu1 %v491_v63 }
 0x24f   :  { %2059 = vmatpush1.bf16.msra.mxu0 %v2612_v10  ;;  %2091 = vmatpush1.bf16.msra.mxu1 %v2615_v14 }
 0x250   :  { %2061 = vmatprep.subr.bf16.mxu0 %v2619_v18  ;;  %2093 = vmatprep.subr.bf16.mxu1 %v2621_v19 }
 0x251   :  { %756 = vmatprep.mubr.f32.mxu0 %v2562_v1  ;;  %827 = vmatprep.mubr.f32.mxu1 %v2562_v1 }
 0x253   :  { %2063 = vmatpush1.bf16.msra.mxu0 %v2624_v23  ;;  %2095 = vmatpush1.bf16.msra.mxu1 %v2628_v27 }
 0x254   :  { %2065 = vmatprep.subr.bf16.mxu0 %v2630_v28  ;;  %2097 = vmatprep.subr.bf16.mxu1 %v2632_v32 }
 0x257   :  { %2067 = vmatpush1.bf16.msra.mxu0 %v2635_v36  ;;  %2099 = vmatpush1.bf16.msra.mxu1 %v2639_v40 }
 0x258   :  { %2069 = vmatprep.subr.bf16.mxu0 %v2641_v41  ;;  %2101 = vmatprep.subr.bf16.mxu1 %v2644_v45 }
 0x25b   :  { %2071 = vmatpush1.bf16.msra.mxu0 %v2647_v52  ;;  %2103 = vmatpush1.bf16.msra.mxu1 %v2651_v53 }
 0x25c   :  { %2073 = vmatprep.subr.bf16.mxu0 %v2653_v54  ;;  %2105 = vmatprep.subr.bf16.mxu1 %v2656_v58 }
 0x25f   :  { %2075 = vmatpush1.bf16.msra.mxu0 %v2659_v0  ;;  %2107 = vmatpush1.bf16.msra.mxu1 %v2663_v2 }
 0x260   :  { %2077 = vmatprep.subr.bf16.mxu0 %v2665_v3  ;;  %2109 = vmatprep.subr.bf16.mxu1 %v2668_v8 }
 0x263   :  { %2079 = vmatpush1.bf16.msra.mxu0 %v2671_v17  ;;  %2111 = vmatpush1.bf16.msra.mxu1 %v2675_v20 }
 0x264   :  { %2081 = vmatprep.subr.bf16.mxu0 %v2677_v21  ;;  %2113 = vmatprep.subr.bf16.mxu1 %v2680_v26 }
 0x267   :  { %2083 = vmatpush1.bf16.msra.mxu0 %v2683_v35  ;;  %2115 = vmatpush1.bf16.msra.mxu1 %v2687_v37 }
 0x268   :  { %2085 = vmatprep.subr.bf16.mxu0 %v2689_v38  ;;  %2117 = vmatprep.subr.bf16.mxu1 %v2692_v43 }
 0x26b   :  { %2087 = vmatpush1.bf16.msra.mxu0 %v2695_v47  ;;  %2119 = vmatpush1.bf16.msra.mxu1 %v2699_v48 }
 0x26c   :  { %2121 = vmatprep.subr.bf16.mxu0 %v2608_v5  ;;  %2153 = vmatprep.subr.bf16.mxu1 %v2610_v9 }
 0x321   :  { %v560_v55 = vpop.f32.mrb[4].mxu0  ;;  %v631_v4 = vpop.f32.mrb[4].mxu1 }
 0x322   :  { %v562_v6 = vpop.f32.mrb[5].mxu0  ;;  %v633_v7 = vpop.f32.mrb[5].mxu1 }
 0x323   :  { %v640_v11 = vcombine.low %v560_v55, %v562_v6  ;;  %v641_v12 = vcombine.low %v631_v4, %v633_v7 }
 0x325   :  { %v648_v13 = vrot.slane %v640_v11, %v2742_v59  ;;  %v655_v15 = vrot.slane %v641_v12, %v2742_v59 }
 0x327   :  { %v656_v22 = vcombine.low %v648_v13, %v655_v15 }
 0x329   :  { %v658_v24 = vadd.f32 %v1787_v16, %v656_v22 }
 0x32b   :  { %v1788_v25 = vmul.f32 -1.442695, %v658_v24  ;;  %v666_v29 = vrot.slane %v658_v24, 2  ;;  %v677_v31 = vrot.slane %v658_v24, 6  ;;  %v674_v39 = vrot.slane %v658_v24, 4  ;;  %v1791_v24 = vld [vmem:[%s3066_s0 + $0x18] sm:$0xff] }
 0x32d   :  { %2439 = vpow2.f32 %v1788_v25  ;;  %v1789_v30 = vmul.f32 -1.442695, %v666_v29  ;;  %v1790_v33 = vmul.f32 -1.442695, %v677_v31 }
 0x32f   :  { %2441 = vpow2.f32 %v1789_v30 }
 0x330   :  { %2443 = vpow2.f32 %v1790_v33 }
 0x337   :  { %v2440_v34 = vpop.eup %2439 }
 0x338   :  { %v662_v42 = vadd.f32 1.0, %v2440_v34 }
 0x339   :  { %v2442_v44 = vpop.eup %2441 }
 0x33a   :  { %2445 = vrcp.f32 %v662_v42  ;;  %v671_v46 = vadd.f32 1.0, %v2442_v44  ;;  %v2444_v49 = vpop.eup %2443 }
 0x33b   :  { %2447 = vtanh.f32 %v674_v39  ;;  %v682_v57 = vadd.f32 1.0, %v2444_v49 }
 0x33c   :  { %2449 = vrcp.f32 %v671_v46 }
 0x33d   :  { %2451 = vrcp.f32 %v682_v57 }
 0x344   :  { %v2446_v50 = vpop.eup %2445 }
 0x345   :  { %v2448_v51 = vpop.eup %2447 }
 0x346   :  { %v2450_v56 = vpop.eup %2449  ;;  %v686_v62 = vmul.f32 %v2448_v51, %v2446_v50 }
 0x347   :  { %v685_v61 = vmul.f32 %v2450_v56, %v2792_v60  ;;  %v2452_v55 = vpop.eup %2451 }
 0x349   :  { %v2835_v63 = vadd.f32 %v686_v62, %v685_v61 }
 0x34b   :  { %2453 = vtanh.f32 %v2835_v63 }
 0x355   :  { %v2454_v4 = vpop.eup %2453 }
 0x356   :  { %v689_v6 = vmul.f32 %v2454_v4, %v2452_v55 }
 0x358   :  { %757 = vmatmul.mubr.f32.vlgmr.msra.gmra.mrb[6].mxu0 %v689_v6  ;;  %828 = vmatmul.mubr.f32.vlgmr.msra.gmra.mrb[6].mxu1 %v689_v6 }
 0x359   :  { %2123 = vmatpush1.bf16.msra.mxu0 %v2612_v10  ;;  %2155 = vmatpush1.bf16.msra.mxu1 %v2615_v14 }
 0x35a   :  { %2125 = vmatprep.subr.bf16.mxu0 %v2619_v18  ;;  %2157 = vmatprep.subr.bf16.mxu1 %v2621_v19 }
 0x35b   :  { %954 = vmatprep.mubr.f32.mxu0 %v2562_v1  ;;  %1025 = vmatprep.mubr.f32.mxu1 %v2562_v1 }
 0x35d   :  { %2127 = vmatpush1.bf16.msra.mxu0 %v2624_v23  ;;  %2159 = vmatpush1.bf16.msra.mxu1 %v2628_v27 }
 0x35e   :  { %2129 = vmatprep.subr.bf16.mxu0 %v2630_v28  ;;  %2161 = vmatprep.subr.bf16.mxu1 %v2632_v32 }
 0x361   :  { %2131 = vmatpush1.bf16.msra.mxu0 %v2635_v36  ;;  %2163 = vmatpush1.bf16.msra.mxu1 %v2639_v40 }
 0x362   :  { %2133 = vmatprep.subr.bf16.mxu0 %v2641_v41  ;;  %2165 = vmatprep.subr.bf16.mxu1 %v2644_v45 }
 0x365   :  { %2135 = vmatpush1.bf16.msra.mxu0 %v2647_v52  ;;  %2167 = vmatpush1.bf16.msra.mxu1 %v2651_v53 }
 0x366   :  { %2137 = vmatprep.subr.bf16.mxu0 %v2653_v54  ;;  %2169 = vmatprep.subr.bf16.mxu1 %v2656_v58 }
 0x369   :  { %2139 = vmatpush1.bf16.msra.mxu0 %v2659_v0  ;;  %2171 = vmatpush1.bf16.msra.mxu1 %v2663_v2 }
 0x36a   :  { %2141 = vmatprep.subr.bf16.mxu0 %v2665_v3  ;;  %2173 = vmatprep.subr.bf16.mxu1 %v2668_v8 }
 0x36d   :  { %2143 = vmatpush1.bf16.msra.mxu0 %v2671_v17  ;;  %2175 = vmatpush1.bf16.msra.mxu1 %v2675_v20 }
 0x36e   :  { %2145 = vmatprep.subr.bf16.mxu0 %v2677_v21  ;;  %2177 = vmatprep.subr.bf16.mxu1 %v2680_v26 }
 0x371   :  { %2147 = vmatpush1.bf16.msra.mxu0 %v2683_v35  ;;  %2179 = vmatpush1.bf16.msra.mxu1 %v2687_v37 }
 0x372   :  { %2149 = vmatprep.subr.bf16.mxu0 %v2689_v38  ;;  %2181 = vmatprep.subr.bf16.mxu1 %v2692_v43 }
 0x375   :  { %2151 = vmatpush1.bf16.msra.mxu0 %v2695_v47  ;;  %2183 = vmatpush1.bf16.msra.mxu1 %v2699_v48 }
 0x376   :  { %2185 = vmatprep.subr.bf16.mxu0 %v2608_v5  ;;  %2217 = vmatprep.subr.bf16.mxu1 %v2610_v9 }
 0x42b   :  { %v758_v60 = vpop.f32.mrb[6].mxu0  ;;  %v829_v7 = vpop.f32.mrb[6].mxu1 }
 0x42c   :  { %v760_v11 = vpop.f32.mrb[7].mxu0  ;;  %v831_v12 = vpop.f32.mrb[7].mxu1 }
 0x42d   :  { %v838_v13 = vcombine.low %v758_v60, %v760_v11  ;;  %v839_v15 = vcombine.low %v829_v7, %v831_v12 }
 0x42f   :  { %v846_v16 = vrot.slane %v838_v13, %v2742_v59  ;;  %v853_v22 = vrot.slane %v839_v15, %v2742_v59 }
 0x431   :  { %v854_v25 = vcombine.low %v846_v16, %v853_v22 }
 0x433   :  { %v856_v29 = vadd.f32 %v1791_v24, %v854_v25 }
 0x435   :  { %v1792_v30 = vmul.f32 -1.442695, %v856_v29  ;;  %v864_v31 = vrot.slane %v856_v29, 2  ;;  %v875_v34 = vrot.slane %v856_v29, 6  ;;  %v872_v44 = vrot.slane %v856_v29, 4  ;;  %v1795_v29 = vld [vmem:[%s3066_s0 + $0x20] sm:$0xff] }
 0x437   :  { %2455 = vpow2.f32 %v1792_v30  ;;  %v1793_v33 = vmul.f32 -1.442695, %v864_v31  ;;  %v1794_v39 = vmul.f32 -1.442695, %v875_v34 }
 0x439   :  { %2457 = vpow2.f32 %v1793_v33 }
 0x43a   :  { %2459 = vpow2.f32 %v1794_v39 }
 0x441   :  { %v2456_v42 = vpop.eup %2455 }
 0x442   :  { %v860_v46 = vadd.f32 1.0, %v2456_v42 }
 0x443   :  { %v2458_v49 = vpop.eup %2457 }
 0x444   :  { %2461 = vrcp.f32 %v860_v46  ;;  %v869_v50 = vadd.f32 1.0, %v2458_v49  ;;  %v2460_v51 = vpop.eup %2459 }
 0x445   :  { %2463 = vtanh.f32 %v872_v44  ;;  %v880_v62 = vadd.f32 1.0, %v2460_v51 }
 0x446   :  { %2465 = vrcp.f32 %v869_v50 }
 0x447   :  { %2467 = vrcp.f32 %v880_v62 }
 0x44e   :  { %v2462_v56 = vpop.eup %2461 }
 0x44f   :  { %v2464_v57 = vpop.eup %2463 }
 0x450   :  { %v2466_v61 = vpop.eup %2465  ;;  %v884_v4 = vmul.f32 %v2464_v57, %v2462_v56 }
 0x451   :  { %v883_v55 = vmul.f32 %v2466_v61, %v2835_v63  ;;  %v2468_v60 = vpop.eup %2467 }
 0x453   :  { %v2878_v6 = vadd.f32 %v884_v4, %v883_v55 }
 0x455   :  { %2469 = vtanh.f32 %v2878_v6 }
 0x45f   :  { %v2470_v7 = vpop.eup %2469 }
 0x460   :  { %v887_v11 = vmul.f32 %v2470_v7, %v2468_v60 }
 0x462   :  { %955 = vmatmul.mubr.f32.vlgmr.msra.gmra.mrb[8].mxu0 %v887_v11  ;;  %1026 = vmatmul.mubr.f32.vlgmr.msra.gmra.mrb[8].mxu1 %v887_v11 }
 0x463   :  { %2187 = vmatpush1.bf16.msra.mxu0 %v2612_v10  ;;  %2219 = vmatpush1.bf16.msra.mxu1 %v2615_v14 }
 0x464   :  { %2189 = vmatprep.subr.bf16.mxu0 %v2619_v18  ;;  %2221 = vmatprep.subr.bf16.mxu1 %v2621_v19 }
 0x465   :  { %1152 = vmatprep.mubr.f32.mxu0 %v2562_v1  ;;  %1223 = vmatprep.mubr.f32.mxu1 %v2562_v1 }
 0x467   :  { %2191 = vmatpush1.bf16.msra.mxu0 %v2624_v23  ;;  %2223 = vmatpush1.bf16.msra.mxu1 %v2628_v27 }
 0x468   :  { %2193 = vmatprep.subr.bf16.mxu0 %v2630_v28  ;;  %2225 = vmatprep.subr.bf16.mxu1 %v2632_v32 }
 0x46b   :  { %2195 = vmatpush1.bf16.msra.mxu0 %v2635_v36  ;;  %2227 = vmatpush1.bf16.msra.mxu1 %v2639_v40 }
 0x46c   :  { %2197 = vmatprep.subr.bf16.mxu0 %v2641_v41  ;;  %2229 = vmatprep.subr.bf16.mxu1 %v2644_v45 }
 0x46f   :  { %2199 = vmatpush1.bf16.msra.mxu0 %v2647_v52  ;;  %2231 = vmatpush1.bf16.msra.mxu1 %v2651_v53 }
 0x470   :  { %2201 = vmatprep.subr.bf16.mxu0 %v2653_v54  ;;  %2233 = vmatprep.subr.bf16.mxu1 %v2656_v58 }
 0x473   :  { %2203 = vmatpush1.bf16.msra.mxu0 %v2659_v0  ;;  %2235 = vmatpush1.bf16.msra.mxu1 %v2663_v2 }
 0x474   :  { %2205 = vmatprep.subr.bf16.mxu0 %v2665_v3  ;;  %2237 = vmatprep.subr.bf16.mxu1 %v2668_v8 }
 0x477   :  { %2207 = vmatpush1.bf16.msra.mxu0 %v2671_v17  ;;  %2239 = vmatpush1.bf16.msra.mxu1 %v2675_v20 }
 0x478   :  { %2209 = vmatprep.subr.bf16.mxu0 %v2677_v21  ;;  %2241 = vmatprep.subr.bf16.mxu1 %v2680_v26 }
 0x47b   :  { %2211 = vmatpush1.bf16.msra.mxu0 %v2683_v35  ;;  %2243 = vmatpush1.bf16.msra.mxu1 %v2687_v37 }
 0x47c   :  { %2213 = vmatprep.subr.bf16.mxu0 %v2689_v38  ;;  %2245 = vmatprep.subr.bf16.mxu1 %v2692_v43 }
 0x47f   :  { %2215 = vmatpush1.bf16.msra.mxu0 %v2695_v47  ;;  %2247 = vmatpush1.bf16.msra.mxu1 %v2699_v48 }
 0x480   :  { %2249 = vmatprep.subr.bf16.mxu0 %v2608_v5  ;;  %2281 = vmatprep.subr.bf16.mxu1 %v2610_v9 }
 0x535   :  { %v956_v63 = vpop.f32.mrb[8].mxu0  ;;  %v1027_v12 = vpop.f32.mrb[8].mxu1 }
 0x536   :  { %v958_v13 = vpop.f32.mrb[9].mxu0  ;;  %v1029_v15 = vpop.f32.mrb[9].mxu1 }
 0x537   :  { %v1036_v16 = vcombine.low %v956_v63, %v958_v13  ;;  %v1037_v22 = vcombine.low %v1027_v12, %v1029_v15 }
 0x539   :  { %v1044_v24 = vrot.slane %v1036_v16, %v2742_v59  ;;  %v1051_v25 = vrot.slane %v1037_v22, %v2742_v59 }
 0x53b   :  { %v1052_v30 = vcombine.low %v1044_v24, %v1051_v25 }
 0x53d   :  { %v1054_v31 = vadd.f32 %v1795_v29, %v1052_v30 }
 0x53f   :  { %v1796_v33 = vmul.f32 -1.442695, %v1054_v31  ;;  %v1062_v34 = vrot.slane %v1054_v31, 2  ;;  %v1073_v42 = vrot.slane %v1054_v31, 6  ;;  %v1070_v49 = vrot.slane %v1054_v31, 4  ;;  %v1799_v31 = vld [vmem:[%s3066_s0 + $0x28] sm:$0xff] }
 0x541   :  { %2471 = vpow2.f32 %v1796_v33  ;;  %v1797_v39 = vmul.f32 -1.442695, %v1062_v34  ;;  %v1798_v44 = vmul.f32 -1.442695, %v1073_v42 }
 0x543   :  { %2473 = vpow2.f32 %v1797_v39 }
 0x544   :  { %2475 = vpow2.f32 %v1798_v44 }
 0x54b   :  { %v2472_v46 = vpop.eup %2471 }
 0x54c   :  { %v1058_v50 = vadd.f32 1.0, %v2472_v46 }
 0x54d   :  { %v2474_v51 = vpop.eup %2473 }
 0x54e   :  { %2477 = vrcp.f32 %v1058_v50  ;;  %v1067_v56 = vadd.f32 1.0, %v2474_v51  ;;  %v2476_v57 = vpop.eup %2475 }
 0x54f   :  { %2479 = vtanh.f32 %v1070_v49  ;;  %v1078_v4 = vadd.f32 1.0, %v2476_v57 }
 0x550   :  { %2481 = vrcp.f32 %v1067_v56 }
 0x551   :  { %2483 = vrcp.f32 %v1078_v4 }
 0x558   :  { %v2478_v61 = vpop.eup %2477 }
 0x559   :  { %v2480_v62 = vpop.eup %2479 }
 0x55a   :  { %v2482_v55 = vpop.eup %2481  ;;  %v1082_v7 = vmul.f32 %v2480_v62, %v2478_v61 }
 0x55b   :  { %v1081_v60 = vmul.f32 %v2482_v55, %v2878_v6  ;;  %v2484_v63 = vpop.eup %2483 }
 0x55d   :  { %v2921_v11 = vadd.f32 %v1082_v7, %v1081_v60 }
 0x55f   :  { %2485 = vtanh.f32 %v2921_v11 }
 0x569   :  { %v2486_v12 = vpop.eup %2485 }
 0x56a   :  { %v1085_v13 = vmul.f32 %v2486_v12, %v2484_v63 }
 0x56c   :  { %1153 = vmatmul.mubr.f32.vlgmr.msra.gmra.mrb[10].mxu0 %v1085_v13  ;;  %1224 = vmatmul.mubr.f32.vlgmr.msra.gmra.mrb[10].mxu1 %v1085_v13 }
 0x56d   :  { %2251 = vmatpush1.bf16.msra.mxu0 %v2612_v10  ;;  %2283 = vmatpush1.bf16.msra.mxu1 %v2615_v14 }
 0x56e   :  { %2253 = vmatprep.subr.bf16.mxu0 %v2619_v18  ;;  %2285 = vmatprep.subr.bf16.mxu1 %v2621_v19 }
 0x56f   :  { %1350 = vmatprep.mubr.f32.mxu0 %v2562_v1  ;;  %1421 = vmatprep.mubr.f32.mxu1 %v2562_v1 }
 0x571   :  { %2255 = vmatpush1.bf16.msra.mxu0 %v2624_v23  ;;  %2287 = vmatpush1.bf16.msra.mxu1 %v2628_v27 }
 0x572   :  { %2257 = vmatprep.subr.bf16.mxu0 %v2630_v28  ;;  %2289 = vmatprep.subr.bf16.mxu1 %v2632_v32 }
 0x575   :  { %2259 = vmatpush1.bf16.msra.mxu0 %v2635_v36  ;;  %2291 = vmatpush1.bf16.msra.mxu1 %v2639_v40 }
 0x576   :  { %2261 = vmatprep.subr.bf16.mxu0 %v2641_v41  ;;  %2293 = vmatprep.subr.bf16.mxu1 %v2644_v45 }
 0x579   :  { %2263 = vmatpush1.bf16.msra.mxu0 %v2647_v52  ;;  %2295 = vmatpush1.bf16.msra.mxu1 %v2651_v53 }
 0x57a   :  { %2265 = vmatprep.subr.bf16.mxu0 %v2653_v54  ;;  %2297 = vmatprep.subr.bf16.mxu1 %v2656_v58 }
 0x57d   :  { %2267 = vmatpush1.bf16.msra.mxu0 %v2659_v0  ;;  %2299 = vmatpush1.bf16.msra.mxu1 %v2663_v2 }
 0x57e   :  { %2269 = vmatprep.subr.bf16.mxu0 %v2665_v3  ;;  %2301 = vmatprep.subr.bf16.mxu1 %v2668_v8 }
 0x581   :  { %2271 = vmatpush1.bf16.msra.mxu0 %v2671_v17  ;;  %2303 = vmatpush1.bf16.msra.mxu1 %v2675_v20 }
 0x582   :  { %2273 = vmatprep.subr.bf16.mxu0 %v2677_v21  ;;  %2305 = vmatprep.subr.bf16.mxu1 %v2680_v26 }
 0x585   :  { %2275 = vmatpush1.bf16.msra.mxu0 %v2683_v35  ;;  %2307 = vmatpush1.bf16.msra.mxu1 %v2687_v37 }
 0x586   :  { %2277 = vmatprep.subr.bf16.mxu0 %v2689_v38  ;;  %2309 = vmatprep.subr.bf16.mxu1 %v2692_v43 }
 0x589   :  { %2279 = vmatpush1.bf16.msra.mxu0 %v2695_v47  ;;  %2311 = vmatpush1.bf16.msra.mxu1 %v2699_v48 }
 0x58a   :  { %2313 = vmatprep.subr.bf16.mxu0 %v2608_v5  ;;  %2345 = vmatprep.subr.bf16.mxu1 %v2610_v9 }
 0x63f   :  { %v1154_v6 = vpop.f32.mrb[10].mxu0  ;;  %v1225_v15 = vpop.f32.mrb[10].mxu1 }
 0x640   :  { %v1156_v16 = vpop.f32.mrb[11].mxu0  ;;  %v1227_v22 = vpop.f32.mrb[11].mxu1 }
 0x641   :  { %v1234_v24 = vcombine.low %v1154_v6, %v1156_v16  ;;  %v1235_v25 = vcombine.low %v1225_v15, %v1227_v22  ;;  %v1680_v16 = vld [vmem:[%s3068_s2] sm:$0xff]  ;;  %v1681_v22 = vld [vmem:[%s3068_s2 + $0x8] sm:$0xff] }
 0x643   :  { %v1242_v29 = vrot.slane %v1234_v24, %v2742_v59  ;;  %v1249_v30 = vrot.slane %v1235_v25, %v2742_v59  ;;  %v2377_v24 = vpack.c.bf16 %v1681_v22, %v1680_v16  ;;  %v2564_v25 = vmov 0.0|0.0  }
 0x645   :  { %v1250_v33 = vcombine.low %v1242_v29, %v1249_v30  ;;  %v1682_v29 = vld [vmem:[%s3068_s2 + $0x10] sm:$0xff]  ;;  %v1683_v30 = vld [vmem:[%s3068_s2 + $0x18] sm:$0xff] }
 0x647   :  { %v1252_v34 = vadd.f32 %v1799_v31, %v1250_v33  ;;  %v2380_v31 = vpack.c.bf16 %v1683_v30, %v1682_v29  ;;  %v1684_v33 = vld [vmem:[%s3068_s2 + $0x20] sm:$0xff] }
 0x649   :  { %v1800_v39 = vmul.f32 -1.442695, %v1252_v34  ;;  %v1260_v5 = vrot.slane %v1252_v34, 2  ;;  %v1271_v42 = vrot.slane %v1252_v34, 6  ;;  %v1268_v49 = vrot.slane %v1252_v34, 4  ;;  %v1685_v34 = vld [vmem:[%s3068_s2 + $0x28] sm:$0xff] }
 0x64b   :  { %2487 = vpow2.f32 %v1800_v39  ;;  %v1801_v9 = vmul.f32 -1.442695, %v1260_v5  ;;  %v1802_v44 = vmul.f32 -1.442695, %v1271_v42  ;;  %v2383_v39 = vpack.c.bf16 %v1685_v34, %v1684_v33  ;;  %v1686_v5 = vld [vmem:[%s3068_s2 + $0x30] sm:$0xff] }
 0x64d   :  { %2489 = vpow2.f32 %v1801_v9  ;;  %v1687_v9 = vld [vmem:[%s3068_s2 + $0x38] sm:$0xff] }
 0x64e   :  { %2491 = vpow2.f32 %v1802_v44  ;;  %v2386_v42 = vpack.c.bf16 %v1687_v9, %v1686_v5  ;;  %v1688_v44 = vld [vmem:[%s3068_s2 + $0x40] sm:$0xff] }
 0x655   :  { %v2488_v46 = vpop.eup %2487 }
 0x656   :  { %v1256_v50 = vadd.f32 1.0, %v2488_v46 }
 0x657   :  { %v2490_v51 = vpop.eup %2489 }
 0x658   :  { %2493 = vrcp.f32 %v1256_v50  ;;  %v1265_v56 = vadd.f32 1.0, %v2490_v51  ;;  %v2492_v57 = vpop.eup %2491  ;;  %v1691_v50 = vld [vmem:[%s3068_s2 + $0x58] sm:$0xff] }
 0x659   :  { %2495 = vtanh.f32 %v1268_v49  ;;  %v1276_v4 = vadd.f32 1.0, %v2492_v57  ;;  %v1690_v49 = vld [vmem:[%s3068_s2 + $0x50] sm:$0xff]  ;;  %v1693_v57 = vld [vmem:[%s3068_s2 + $0x68] sm:$0xff] }
 0x65a   :  { %2497 = vrcp.f32 %v1265_v56  ;;  %v2392_v51 = vpack.c.bf16 %v1691_v50, %v1690_v49  ;;  %v1692_v56 = vld [vmem:[%s3068_s2 + $0x60] sm:$0xff] }
 0x65b   :  { %2499 = vrcp.f32 %v1276_v4 }
 0x662   :  { %v2494_v61 = vpop.eup %2493 }
 0x663   :  { %v2496_v62 = vpop.eup %2495 }
 0x664   :  { %v2498_v55 = vpop.eup %2497  ;;  %v1280_v7 = vmul.f32 %v2496_v62, %v2494_v61  ;;  %v2395_v61 = vpack.c.bf16 %v1693_v57, %v1692_v56  ;;  %v1694_v62 = vld [vmem:[%s3068_s2 + $0x70] sm:$0xff] }
 0x665   :  { %v1279_v60 = vmul.f32 %v2498_v55, %v2921_v11  ;;  %v2500_v12 = vpop.eup %2499  ;;  %v1695_v55 = vld [vmem:[%s3068_s2 + $0x78] sm:$0xff] }
 0x666   :  { %v2398_v4 = vpack.c.bf16 %v1695_v55, %v1694_v62 }
 0x667   :  { %v2964_v63 = vadd.f32 %v1280_v7, %v1279_v60 }
 0x669   :  { %2501 = vtanh.f32 %v2964_v63 }
 0x673   :  { %v2502_v13 = vpop.eup %2501 }
 0x674   :  { %v1283_v6 = vmul.f32 %v2502_v13, %v2500_v12 }
 0x676   :  { %1351 = vmatmul.mubr.f32.vlgmr.msra.gmra.mrb[12].mxu0 %v1283_v6  ;;  %1422 = vmatmul.mubr.f32.vlgmr.msra.gmra.mrb[12].mxu1 %v1283_v6 }
 0x677   :  { %2315 = vmatpush1.bf16.msra.mxu0 %v2612_v10  ;;  %2347 = vmatpush1.bf16.msra.mxu1 %v2615_v14 }
 0x678   :  { %2317 = vmatprep.subr.bf16.mxu0 %v2619_v18  ;;  %2349 = vmatprep.subr.bf16.mxu1 %v2621_v19 }
 0x679   :  { %1548 = vmatprep.mubr.f32.mxu0 %v2562_v1  ;;  %1619 = vmatprep.mubr.f32.mxu1 %v2562_v1 }
 0x67b   :  { %2319 = vmatpush1.bf16.msra.mxu0 %v2624_v23  ;;  %2351 = vmatpush1.bf16.msra.mxu1 %v2628_v27 }
 0x67c   :  { %2321 = vmatprep.subr.bf16.mxu0 %v2630_v28  ;;  %2353 = vmatprep.subr.bf16.mxu1 %v2632_v32 }
 0x67f   :  { %2323 = vmatpush1.bf16.msra.mxu0 %v2635_v36  ;;  %2355 = vmatpush1.bf16.msra.mxu1 %v2639_v40  ;;  %v1803_v36 = vld [vmem:[%s3066_s0 + $0x30] sm:$0xff] }
 0x680   :  { %2325 = vmatprep.subr.bf16.mxu0 %v2641_v41  ;;  %2357 = vmatprep.subr.bf16.mxu1 %v2644_v45 }
 0x683   :  { %2327 = vmatpush1.bf16.msra.mxu0 %v2647_v52  ;;  %2359 = vmatpush1.bf16.msra.mxu1 %v2651_v53 }
 0x684   :  { %2329 = vmatprep.subr.bf16.mxu0 %v2653_v54  ;;  %2361 = vmatprep.subr.bf16.mxu1 %v2656_v58 }
 0x687   :  { %2331 = vmatpush1.bf16.msra.mxu0 %v2659_v0  ;;  %2363 = vmatpush1.bf16.msra.mxu1 %v2663_v2 }
 0x688   :  { %2333 = vmatprep.subr.bf16.mxu0 %v2665_v3  ;;  %2365 = vmatprep.subr.bf16.mxu1 %v2668_v8 }
 0x68b   :  { %2335 = vmatpush1.bf16.msra.mxu0 %v2671_v17  ;;  %2367 = vmatpush1.bf16.msra.mxu1 %v2675_v20 }
 0x68c   :  { %2337 = vmatprep.subr.bf16.mxu0 %v2677_v21  ;;  %2369 = vmatprep.subr.bf16.mxu1 %v2680_v26 }
 0x68f   :  { %2339 = vmatpush1.bf16.msra.mxu0 %v2683_v35  ;;  %2371 = vmatpush1.bf16.msra.mxu1 %v2687_v37 }
 0x690   :  { %2341 = vmatprep.subr.bf16.mxu0 %v2689_v38  ;;  %2373 = vmatprep.subr.bf16.mxu1 %v2692_v43 }
 0x693   :  { %2343 = vmatpush1.bf16.msra.mxu0 %v2695_v47  ;;  %2375 = vmatpush1.bf16.msra.mxu1 %v2699_v48 }
 0x694   :  { %2376 = vmatprep.subr.bf16.mxu0 %v2564_v25 }
 0x749   :  { %v1352_v10 = vpop.f32.mrb[12].mxu0  ;;  %v1423_v14 = vpop.f32.mrb[12].mxu1 }
 0x74a   :  { %v1354_v18 = vpop.f32.mrb[13].mxu0  ;;  %v1425_v19 = vpop.f32.mrb[13].mxu1 }
 0x74b   :  { %v1432_v23 = vcombine.low %v1352_v10, %v1354_v18  ;;  %v1433_v27 = vcombine.low %v1423_v14, %v1425_v19  ;;  %v1807_v18 = vld [vmem:[%s3066_s0 + $0x38] sm:$0xff] }
 0x74d   :  { %v1440_v28 = vrot.slane %v1432_v23, %v2742_v59  ;;  %v1447_v32 = vrot.slane %v1433_v27, %v2742_v59 }
 0x74f   :  { %v1448_v40 = vcombine.low %v1440_v28, %v1447_v32 }
 0x751   :  { %v1450_v41 = vadd.f32 %v1803_v36, %v1448_v40 }
 0x753   :  { %v1804_v45 = vmul.f32 -1.442695, %v1450_v41  ;;  %v1458_v52 = vrot.slane %v1450_v41, 2  ;;  %v1469_v54 = vrot.slane %v1450_v41, 6  ;;  %v1466_v2 = vrot.slane %v1450_v41, 4 }
 0x755   :  { %2503 = vpow2.f32 %v1804_v45  ;;  %v1805_v53 = vmul.f32 -1.442695, %v1458_v52  ;;  %v1806_v58 = vmul.f32 -1.442695, %v1469_v54 }
 0x757   :  { %2505 = vpow2.f32 %v1805_v53 }
 0x758   :  { %2507 = vpow2.f32 %v1806_v58 }
 0x75f   :  { %v2504_v0 = vpop.eup %2503 }
 0x760   :  { %v1454_v3 = vadd.f32 1.0, %v2504_v0 }
 0x761   :  { %v2506_v8 = vpop.eup %2505 }
 0x762   :  { %2509 = vrcp.f32 %v1454_v3  ;;  %v1463_v17 = vadd.f32 1.0, %v2506_v8  ;;  %v2508_v20 = vpop.eup %2507 }
 0x763   :  { %2511 = vtanh.f32 %v1466_v2  ;;  %v1474_v37 = vadd.f32 1.0, %v2508_v20 }
 0x764   :  { %2513 = vrcp.f32 %v1463_v17 }
 0x765   :  { %2515 = vrcp.f32 %v1474_v37  ;;  %v1811_v37 = vld [vmem:[#allocation2] ss:$0 sm:$0xff] }
 0x76c   :  { %v2510_v21 = vpop.eup %2509 }
 0x76d   :  { %v2512_v26 = vpop.eup %2511 }
 0x76e   :  { %v2514_v35 = vpop.eup %2513  ;;  %v1478_v43 = vmul.f32 %v2512_v26, %v2510_v21 }
 0x76f   :  { %v1477_v38 = vmul.f32 %v2514_v35, %v2964_v63  ;;  %v2516_v48 = vpop.eup %2515 }
 0x771   :  { %v3005_v47 = vadd.f32 %v1478_v43, %v1477_v38 }
 0x773   :  { %2517 = vtanh.f32 %v3005_v47 }
 0x77d   :  { %v2518_v11 = vpop.eup %2517 }
 0x77e   :  { %v1481_v15 = vmul.f32 %v2518_v11, %v2516_v48 }
 0x780   :  { %1549 = vmatmul.mubr.f32.vlgmr.msra.gmra.mrb[14].mxu0 %v1481_v15  ;;  %1620 = vmatmul.mubr.f32.vlgmr.msra.gmra.mrb[14].mxu1 %v1481_v15 }
 0x781   :  { %2378 = vmatpush3.bf16.msra.mxu0 %v2377_v24  ;;  %1861 = vmatprep.mubr.msk.f32.mxu0 %vm2565_vm0, %v2562_v1  ;;  %v1689_v1 = vld [vmem:[%s3068_s2 + $0x48] sm:$0xff] }
 0x782   :  { %2379 = vmatprep.subr.bf16.mxu0 %v2564_v25  ;;  %v2389_v46 = vpack.c.bf16 %v1689_v1, %v1688_v44 }
 0x785   :  { %2381 = vmatpush3.bf16.msra.mxu0 %v2380_v31 }
 0x786   :  { %2382 = vmatprep.subr.bf16.mxu0 %v2564_v25 }
 0x789   :  { %2384 = vmatpush3.bf16.msra.mxu0 %v2383_v39 }
 0x78a   :  { %2385 = vmatprep.subr.bf16.mxu0 %v2564_v25 }
 0x78d   :  { %2387 = vmatpush3.bf16.msra.mxu0 %v2386_v42 }
 0x78e   :  { %2388 = vmatprep.subr.bf16.mxu0 %v2564_v25 }
 0x791   :  { %2390 = vmatpush3.bf16.msra.mxu0 %v2389_v46 }
 0x792   :  { %2391 = vmatprep.subr.bf16.mxu0 %v2564_v25 }
 0x795   :  { %2393 = vmatpush3.bf16.msra.mxu0 %v2392_v51 }
 0x796   :  { %2394 = vmatprep.subr.bf16.mxu0 %v2564_v25 }
 0x799   :  { %2396 = vmatpush3.bf16.msra.mxu0 %v2395_v61 }
 0x79a   :  { %2397 = vmatprep.subr.bf16.mxu0 %v2564_v25 }
 0x79d   :  { %2399 = vmatpush3.bf16.msra.mxu0 %v2398_v4 }
 0x853   :  { %v1550_v60 = vpop.f32.mrb[14].mxu0  ;;  %v1621_v7 = vpop.f32.mrb[14].mxu1 }
 0x854   :  { %v1552_v63 = vpop.f32.mrb[15].mxu0  ;;  %v1623_v12 = vpop.f32.mrb[15].mxu1 }
 0x855   :  { %v1630_v13 = vcombine.low %v1550_v60, %v1552_v63  ;;  %v1631_v6 = vcombine.low %v1621_v7, %v1623_v12 }
 0x857   :  { %v1638_v10 = vrot.slane %v1630_v13, %v2742_v59  ;;  %v1645_v14 = vrot.slane %v1631_v6, %v2742_v59 }
 0x859   :  { %v1646_v19 = vcombine.low %v1638_v10, %v1645_v14 }
 0x85b   :  { %v1648_v23 = vadd.f32 %v1807_v18, %v1646_v19 }
 0x85d   :  { %v1808_v27 = vmul.f32 -1.442695, %v1648_v23  ;;  %v1656_v28 = vrot.slane %v1648_v23, 2  ;;  %v1667_v36 = vrot.slane %v1648_v23, 6  ;;  %v1664_v45 = vrot.slane %v1648_v23, 4 }
 0x85f   :  { %2519 = vpow2.f32 %v1808_v27  ;;  %v1809_v32 = vmul.f32 -1.442695, %v1656_v28  ;;  %v1810_v40 = vmul.f32 -1.442695, %v1667_v36 }
 0x861   :  { %2521 = vpow2.f32 %v1809_v32 }
 0x862   :  { %2523 = vpow2.f32 %v1810_v40 }
 0x869   :  { %v2520_v41 = vpop.eup %2519 }
 0x86a   :  { %v1652_v52 = vadd.f32 1.0, %v2520_v41 }
 0x86b   :  { %v2522_v53 = vpop.eup %2521 }
 0x86c   :  { %2525 = vrcp.f32 %v1652_v52  ;;  %v1661_v59 = vadd.f32 1.0, %v2522_v53  ;;  %v2524_v54 = vpop.eup %2523 }
 0x86d   :  { %2527 = vtanh.f32 %v1664_v45  ;;  %v1672_v3 = vadd.f32 1.0, %v2524_v54 }
 0x86e   :  { %2529 = vrcp.f32 %v1661_v59 }
 0x86f   :  { %2531 = vrcp.f32 %v1672_v3 }
 0x876   :  { %v2526_v58 = vpop.eup %2525 }
 0x877   :  { %v2528_v0 = vpop.eup %2527 }
 0x878   :  { %v2530_v2 = vpop.eup %2529  ;;  %v1676_v17 = vmul.f32 %v2528_v0, %v2526_v58 }
 0x879   :  { %v1675_v8 = vmul.f32 %v2530_v2, %v3005_v47  ;;  %v2532_v21 = vpop.eup %2531 }
 0x87b   :  { %v1677_v20 = vadd.f32 %v1676_v17, %v1675_v8 }
 0x87d   :  { %2533 = vtanh.f32 %v1677_v20 }
 0x887   :  { %v2534_v26 = vpop.eup %2533 }
 0x888   :  { %v1679_v35 = vmul.f32 %v2534_v26, %v2532_v21 }
 0x88a   :  { %1862 = vmatmul.mubr.f32.vlgmr.msra.gmra.mrb[16].mxu0 %v1679_v35 }
 0x95d   :  { %v1769_v38 = vpop.f32.mrb[16].mxu0 }
 0x95e   :  { %v1770_v43 = vadd.f32 %v1811_v37, %v1769_v38  ;;  %v1863_v48 = vpop.f32.mrb[17].mxu0 }
 0x960   :  { %1774 = vst.msk [vmem:[%s3070_s4] sm:$0x3] %vm1773_vm1, %v1770_v43 }
 0x961   :  { %1779 = vsyncpa [#allocation4], 1 }

</bundles_post_ra>
